<compile_context>
chip_gen: v6e
topology: v6e:2x2x1
jax: 0.10.0
libtpu: 0.0.40
codegen_flags: <defaults>
</compile_context>

<pallas_src>
import math

import jax
import jax.numpy as jnp
from jax.experimental import pallas as pl
from jax.experimental.pallas import tpu as pltpu

K_IN = 28 * 28      # 784 (full minor dim of x -> legal un-padded block width)
H = 512
N_OUT = 10
N_PAD = 128         # lane-dense output width (wrapper slices back to 10)


def mlp_kernel(x_ref, w1_ref, b1_ref, w2_ref, b2_ref, w3_ref, b3_ref, o_ref):
    # In-kernel f32 -> bf16 cast of the input tile (VPU; co-issues under the MXU).
    x = x_ref[...].astype(jnp.bfloat16)
    # Layer 1: (tb, 784) @ (784, 512), f32 accumulate, f32 bias + ReLU.
    h1 = jnp.dot(x, w1_ref[...], preferred_element_type=jnp.float32)
    h1 = jnp.maximum(h1 + b1_ref[...], 0.0)
    # Layer 2: (tb, 512) @ (512, 512), f32 accumulate, f32 bias + ReLU.
    h2 = jnp.dot(h1.astype(jnp.bfloat16), w2_ref[...], preferred_element_type=jnp.float32)
    h2 = jnp.maximum(h2 + b2_ref[...], 0.0)
    # Layer 3: (tb, 512) @ (512, 128); output columns 10..127 are zero padding.
    o_ref[...] = (
        jnp.dot(h2.astype(jnp.bfloat16), w3_ref[...], preferred_element_type=jnp.float32)
        + b3_ref[...]
    )


def _round_up(n, m):
    return ((n + m - 1) // m) * m


def _choose_tb(B):
    """Batch-tile selection.

    * multiples of 16 rows (bf16 sublane packing of the MXU M dimension)
    * big tiles (<= 512) amortize the ~0.35us fixed per-grid-step overhead (v6e/v7x)
    * an even number of grid steps keeps both v7x TensorCores busy once B is large enough
      for two tiles; VMEM footprint stays a few MiB even at tb = 512.
    """
    if B <= 16:
        return B                                # exact-fit single block (equals full dim)
    if B <= 32:
        return _round_up(B, 16)                 # still a single tile
    if B <= 1024:
        return _round_up(pl.cdiv(B, 2), 16)     # two tiles -> both v7x TCs get work
    tb = 512
    steps = pl.cdiv(B, tb)
    if steps % 2:                               # make the step count even (megacore balance)
        tb = _round_up(pl.cdiv(B, steps + 1), 16)
    return tb


def prepare_params(params):
    """One-time host-side prep: bf16 weights stored (in, out); pad the 10-wide output layer
    to 128 lanes (zeros beyond col 10) so kernel stores are unmasked."""
    w1 = params["w1"].astype(jnp.bfloat16)                                       # (784, 512)
    w2 = params["w2"].astype(jnp.bfloat16)                                       # (512, 512)
    w3 = jnp.zeros((H, N_PAD), jnp.bfloat16).at[:, :N_OUT].set(
        params["w3"].astype(jnp.bfloat16))                                       # (512, 128)
    b3 = jnp.zeros((1, N_PAD), jnp.float32).at[:, :N_OUT].set(params["b3"])      # (1, 128)
    return {"w1": w1, "b1": params["b1"], "w2": w2, "b2": params["b2"], "w3": w3, "b3": b3}


def neural_network_forward(x_nchw, prepped, *, tb=None):
    """Full MLP forward as a single batch-tiled Pallas kernel.

    x_nchw : (B, 1, 28, 28) float32 (NCHW, as PyTorch would pass it)
    prepped: output of prepare_params (bf16 weights, f32 biases, lane-padded layer 3)
    """
    B = x_nchw.shape[0]
    x = x_nchw.reshape(B, K_IN)          # nn.Flatten: metadata-only reshape, x stays f32 in HBM

    if tb is None:
        tb = _choose_tb(B)

    w1, b1 = prepped["w1"], prepped["b1"]
    w2, b2 = prepped["w2"], prepped["b2"]
    w3, b3 = prepped["w3"], prepped["b3"]

    def resident(shape):
        # Constant block index -> DMA'd once, stays VMEM-resident across all batch tiles.
        return pl.BlockSpec(shape, lambda i: (0, 0))

    out = pl.pallas_call(
        mlp_kernel,
        out_shape=jax.ShapeDtypeStruct((B, N_PAD), jnp.float32),
        grid=(pl.cdiv(B, tb),),                 # ragged last tile is masked by Pallas
        in_specs=[
            pl.BlockSpec((tb, K_IN), lambda i: (i, 0)),   # x: batch-tiled, pipelined, raw f32
            resident((K_IN, H)), resident((1, H)),        # w1, b1
            resident((H, H)),    resident((1, H)),        # w2, b2
            resident((H, N_PAD)), resident((1, N_PAD)),   # w3, b3
        ],
        out_specs=pl.BlockSpec((tb, N_PAD), lambda i: (i, 0)),
        compiler_params=pltpu.CompilerParams(
            dimension_semantics=("parallel",),  # batch tiles shard across TCs (v7x megacore)
        ),
    )(x, w1, b1, w2, b2, w3, b3)
    return out[:, :N_OUT]


def init_params(key):
    """Deterministic init mimicking nn.Linear's default (Kaiming-uniform), stored f32."""
    def linear_init(k, fan_in, fan_out):
        kw, kb = jax.random.split(k)
        bound = 1.0 / math.sqrt(fan_in)  # kaiming_uniform(a=sqrt(5)) -> 1/sqrt(fan_in)
        # Stored as (in, out) == transpose of PyTorch's (out, in) weight.
        w = jax.random.uniform(kw, (fan_in, fan_out), jnp.float32, -bound, bound)
        b = jax.random.uniform(kb, (1, fan_out), jnp.float32, -bound, bound)
        return w, b

    k1, k2, k3 = jax.random.split(key, 3)
    w1, b1 = linear_init(k1, K_IN, H)
    w2, b2 = linear_init(k2, H, H)
    w3, b3 = linear_init(k3, H, N_OUT)
    return {"w1": w1, "b1": b1, "w2": w2, "b2": b2, "w3": w3, "b3": b3}


def reference_forward(x_nchw, params):
    """Pure-JAX reference of the same math (bf16 matmul operands, f32 accumulation)."""
    x = x_nchw.reshape(x_nchw.shape[0], -1).astype(jnp.bfloat16)
    w1 = params["w1"].astype(jnp.bfloat16)
    w2 = params["w2"].astype(jnp.bfloat16)
    w3 = params["w3"].astype(jnp.bfloat16)
    h1 = jnp.maximum(jnp.dot(x, w1, preferred_element_type=jnp.float32) + params["b1"], 0.0)
    h2 = jnp.maximum(
        jnp.dot(h1.astype(jnp.bfloat16), w2, preferred_element_type=jnp.float32) + params["b2"], 0.0
    )
    return jnp.dot(h2.astype(jnp.bfloat16), w3, preferred_element_type=jnp.float32) + params["b3"]


if __name__ == "__main__":
    key = jax.random.PRNGKey(0)
    k_params, k_x = jax.random.split(key)

    params = init_params(k_params)
    prepped = prepare_params(params)

    # Small batch, MNIST-shaped input in NCHW as the PyTorch module expects.
    x = jax.random.normal(k_x, (2, 1, 28, 28), dtype=jnp.float32)

    logits = neural_network_forward(x, prepped)
    logits = jax.block_until_ready(logits)

    ref = reference_forward(x, params)
    assert logits.shape == (2, 10)
    err = float(jnp.max(jnp.abs(logits - ref)))
    assert jnp.allclose(logits, ref, atol=1e-2, rtol=1e-2), err

    print("KERNEL_OK")
</pallas_src>

<mosaic_0001>
module attributes {stable_mosaic.version = 11 : i64} {
  func.func @mlp_kernel(%arg0: i32, %arg1: memref<2x784xf32, #tpu.memory_space<vmem>>, %arg2: memref<784x512xbf16, #tpu.memory_space<vmem>>, %arg3: memref<1x512xf32, #tpu.memory_space<vmem>>, %arg4: memref<512x512xbf16, #tpu.memory_space<vmem>>, %arg5: memref<1x512xf32, #tpu.memory_space<vmem>>, %arg6: memref<512x128xbf16, #tpu.memory_space<vmem>>, %arg7: memref<1x128xf32, #tpu.memory_space<vmem>>, %arg8: memref<2x128xf32, #tpu.memory_space<vmem>>) attributes {dimension_semantics = [#tpu.dimension_semantics<parallel>], iteration_bounds = array<i64: 1>, scalar_prefetch = 0 : i64, scratch_operands = 0 : i64, tpu.core_type = #tpu.core_type<tc>, window_params = [{transform_indices = @transform_0, window_bounds = array<i64: 2, 784>}, {pipeline_mode = #tpu.pipeline_mode<synchronous>, transform_indices = @transform_1, window_bounds = array<i64: 784, 512>}, {pipeline_mode = #tpu.pipeline_mode<synchronous>, transform_indices = @transform_2, window_bounds = array<i64: 1, 512>}, {pipeline_mode = #tpu.pipeline_mode<synchronous>, transform_indices = @transform_3, window_bounds = array<i64: 512, 512>}, {pipeline_mode = #tpu.pipeline_mode<synchronous>, transform_indices = @transform_4, window_bounds = array<i64: 1, 512>}, {pipeline_mode = #tpu.pipeline_mode<synchronous>, transform_indices = @transform_5, window_bounds = array<i64: 512, 128>}, {pipeline_mode = #tpu.pipeline_mode<synchronous>, transform_indices = @transform_6, window_bounds = array<i64: 1, 128>}, {transform_indices = @transform_7, window_bounds = array<i64: 2, 128>}]} {
    %c0 = arith.constant 0 : index
    %c0_0 = arith.constant 0 : index
    %0 = vector.load %arg1[%c0, %c0_0] : memref<2x784xf32, #tpu.memory_space<vmem>>, vector<2x784xf32>
    %1 = arith.truncf %0 : vector<2x784xf32> to vector<2x784xbf16>
    %c0_1 = arith.constant 0 : index
    %c0_2 = arith.constant 0 : index
    %2 = vector.load %arg2[%c0_1, %c0_2] : memref<784x512xbf16, #tpu.memory_space<vmem>>, vector<784x512xbf16>
    %cst = arith.constant dense<0.000000e+00> : vector<2x512xf32>
    %3 = tpu.matmul %1, %2, %cst {dimension_numbers = #tpu.dot_dimension_numbers<[1], [0], [0], [1], [0, 0, 1, 1], [], []>} : vector<2x784xbf16>, vector<784x512xbf16>, vector<2x512xf32> -> vector<2x512xf32>
    %c0_3 = arith.constant 0 : index
    %c0_4 = arith.constant 0 : index
    %4 = vector.load %arg3[%c0_3, %c0_4] : memref<1x512xf32, #tpu.memory_space<vmem>>, vector<1x512xf32>
    %5 = vector.broadcast %4 : vector<1x512xf32> to vector<2x512xf32>
    %6 = arith.addf %3, %5 : vector<2x512xf32>
    %cst_5 = arith.constant 0.000000e+00 : f32
    %7 = vector.broadcast %cst_5 : f32 to vector<2x512xf32>
    %8 = arith.maximumf %6, %7 : vector<2x512xf32>
    %9 = arith.truncf %8 : vector<2x512xf32> to vector<2x512xbf16>
    %c0_6 = arith.constant 0 : index
    %c0_7 = arith.constant 0 : index
    %10 = vector.load %arg4[%c0_6, %c0_7] : memref<512x512xbf16, #tpu.memory_space<vmem>>, vector<512x512xbf16>
    %cst_8 = arith.constant dense<0.000000e+00> : vector<2x512xf32>
    %11 = tpu.matmul %9, %10, %cst_8 {dimension_numbers = #tpu.dot_dimension_numbers<[1], [0], [0], [1], [0, 0, 1, 1], [], []>} : vector<2x512xbf16>, vector<512x512xbf16>, vector<2x512xf32> -> vector<2x512xf32>
    %c0_9 = arith.constant 0 : index
    %c0_10 = arith.constant 0 : index
    %12 = vector.load %arg5[%c0_9, %c0_10] : memref<1x512xf32, #tpu.memory_space<vmem>>, vector<1x512xf32>
    %13 = vector.broadcast %12 : vector<1x512xf32> to vector<2x512xf32>
    %14 = arith.addf %11, %13 : vector<2x512xf32>
    %cst_11 = arith.constant 0.000000e+00 : f32
    %15 = vector.broadcast %cst_11 : f32 to vector<2x512xf32>
    %16 = arith.maximumf %14, %15 : vector<2x512xf32>
    %17 = arith.truncf %16 : vector<2x512xf32> to vector<2x512xbf16>
    %c0_12 = arith.constant 0 : index
    %c0_13 = arith.constant 0 : index
    %18 = vector.load %arg6[%c0_12, %c0_13] : memref<512x128xbf16, #tpu.memory_space<vmem>>, vector<512x128xbf16>
    %cst_14 = arith.constant dense<0.000000e+00> : vector<2x128xf32>
    %19 = tpu.matmul %17, %18, %cst_14 {dimension_numbers = #tpu.dot_dimension_numbers<[1], [0], [0], [1], [0, 0, 1, 1], [], []>} : vector<2x512xbf16>, vector<512x128xbf16>, vector<2x128xf32> -> vector<2x128xf32>
    %c0_15 = arith.constant 0 : index
    %c0_16 = arith.constant 0 : index
    %20 = vector.load %arg7[%c0_15, %c0_16] : memref<1x128xf32, #tpu.memory_space<vmem>>, vector<1x128xf32>
    %21 = vector.broadcast %20 : vector<1x128xf32> to vector<2x128xf32>
    %22 = arith.addf %19, %21 : vector<2x128xf32>
    %c0_17 = arith.constant 0 : index
    %c0_18 = arith.constant 0 : index
    %23 = vector.load %arg8[%c0_17, %c0_18] : memref<2x128xf32, #tpu.memory_space<vmem>>, vector<2x128xf32>
    tpu.vector_store %arg8[%c0_17, %c0_18], %22 {strides = array<i32>} : memref<2x128xf32, #tpu.memory_space<vmem>>, vector<2x128xf32>,
    return
  }
  func.func @transform_0(%arg0: i32) -> (i32, i32) {
    %c0_i32 = arith.constant 0 : i32
    %c0_i32_0 = arith.constant 0 : i32
    return %arg0, %c0_i32 : i32, i32
  }
  func.func @transform_1(%arg0: i32) -> (i32, i32) {
    %c0_i32 = arith.constant 0 : i32
    %c0_i32_0 = arith.constant 0 : i32
    %c0_i32_1 = arith.constant 0 : i32
    return %c0_i32, %c0_i32_0 : i32, i32
  }
  func.func @transform_2(%arg0: i32) -> (i32, i32) {
    %c0_i32 = arith.constant 0 : i32
    %c0_i32_0 = arith.constant 0 : i32
    %c0_i32_1 = arith.constant 0 : i32
    return %c0_i32, %c0_i32_0 : i32, i32
  }
  func.func @transform_3(%arg0: i32) -> (i32, i32) {
    %c0_i32 = arith.constant 0 : i32
    %c0_i32_0 = arith.constant 0 : i32
    %c0_i32_1 = arith.constant 0 : i32
    return %c0_i32, %c0_i32_0 : i32, i32
  }
  func.func @transform_4(%arg0: i32) -> (i32, i32) {
    %c0_i32 = arith.constant 0 : i32
    %c0_i32_0 = arith.constant 0 : i32
    %c0_i32_1 = arith.constant 0 : i32
    return %c0_i32, %c0_i32_0 : i32, i32
  }
  func.func @transform_5(%arg0: i32) -> (i32, i32) {
    %c0_i32 = arith.constant 0 : i32
    %c0_i32_0 = arith.constant 0 : i32
    %c0_i32_1 = arith.constant 0 : i32
    return %c0_i32, %c0_i32_0 : i32, i32
  }
  func.func @transform_6(%arg0: i32) -> (i32, i32) {
    %c0_i32 = arith.constant 0 : i32
    %c0_i32_0 = arith.constant 0 : i32
    %c0_i32_1 = arith.constant 0 : i32
    return %c0_i32, %c0_i32_0 : i32, i32
  }
  func.func @transform_7(%arg0: i32) -> (i32, i32) {
    %c0_i32 = arith.constant 0 : i32
    %c0_i32_0 = arith.constant 0 : i32
    return %arg0, %c0_i32 : i32, i32
  }
}

</mosaic_0001>

<bundles_post_ra>
// kernel: tpu_custom_call.1
= control target key start
LH: loop header
LB: loop body
LE: loop exit
PB: predicated region body
PF: predicated region fallthrough
CT: control target
= control target key end

     0   :  { %12 = vsyncpa [#allocation3], 0  ;;  %s4230_s0 = inlined_call_operand.hbm [shape: f32[2,784], index: 0, kind: input, shape index: {}]   ;;  %s4231_s1 = inlined_call_operand.hbm [shape: bf16[784,512], index: 1, kind: input, shape index: {}]   ;;  %s4232_s2 = inlined_call_operand.hbm [shape: f32[1,512], index: 2, kind: input, shape index: {}]   ;;  %s4233_s3 = inlined_call_operand.hbm [shape: bf16[512,512], index: 3, kind: input, shape index: {}]   ;;  %s4234_s4 = inlined_call_operand.vmem [shape: f32[1,512], index: 4, kind: input, shape index: {}]   ;;  %s4235_s5 = inlined_call_operand.hbm [shape: bf16[512,128], index: 5, kind: input, shape index: {}]   ;;  %s4236_s6 = inlined_call_operand.vmem [shape: f32[1,128], index: 6, kind: input, shape index: {}]   ;;  %s4237_s7 = inlined_call_operand.hbm [shape: f32[2,128], index: 7, kind: output, shape index: {}]  }
   0x1   :  { %13 = vsyncpa [#allocation6], 0 }
   0x2   :  { %14 = vsyncpa [#allocation9], 0 }
   0x3   :  { %15 = vsyncpa [#allocation4], 0  ;;  %s4067_s24 = smov [#allocation5]  }
   0x4   :  { %s31_s25 = sshll.u32 %s4067_s24, 4  ;;  %s32_s25 = int_to_ptr.vmem [resolvable:$true] %s31_s25 }
   0x5   :  { %s3947_s26 = scalar_lea.vmem %s32_s25, 25088  ;;  %p3952_p1 = scmp.lt.s32.totalorder %s32_s25, %s32_s25 }
   0x6   :  { %p3948_p0 = scmp.ne.s32.totalorder %s32_s25, %s3947_s26  ;;  %p3953_p2 = scmp.lt.s32.totalorder %s3947_s26, %s3947_s26 }
   0x8   :  { %p3954_p3 = por %p3953_p2, %p3952_p1 }
   0xa   :  { %p3955_p4 = pnand %p3954_p3, %p3948_p0 }
   0xc   :  { %3958 = shalt.err (!%p3955_p4)
}
   0xd   :  { %s4068_s27 = smov 256   ;;  %s4069_s28 = smov 16  }
   0xe   :  { %37 = dma.hbm_to_vmem [thread:$0]  %s4231_s1, 25088, %s32_s25, [#allocation6], %s4068_s27, %s4068_s27, %s4069_s28  }
   0xf   :  { %s4070_s8 = smov [#allocation8]   ;;  %s4071_s10 = smov [#allocation2]  }
  0x10   :  { %s53_s9 = sshll.u32 %s4070_s8, 4  ;;  %s22_s11 = sshll.u32 %s4071_s10, 4  ;;  %s54_s9 = int_to_ptr.vmem [resolvable:$true] %s53_s9  ;;  %s23_s11 = int_to_ptr.vmem [resolvable:$true] %s22_s11 }
  0x11   :  { %s3967_s12 = scalar_lea.vmem %s54_s9, 16384  ;;  %p3972_p6 = scmp.lt.s32.totalorder %s54_s9, %s54_s9 }
  0x12   :  { %p3968_p5 = scmp.ne.s32.totalorder %s54_s9, %s3967_s12  ;;  %p3973_p7 = scmp.lt.s32.totalorder %s3967_s12, %s3967_s12 }
  0x14   :  { %p3974_p8 = por %p3973_p7, %p3972_p6 }
  0x16   :  { %p3975_p9 = pnand %p3974_p8, %p3968_p5 }
  0x18   :  { %3978 = shalt.err (!%p3975_p9)
}
  0x19   :  { %59 = dma.hbm_to_vmem [thread:$0]  %s4233_s3, 16384, %s54_s9, [#allocation9], %s4068_s27, %s4068_s27, %s4069_s28  }
  0x1a   :  { %s3987_s15 = scalar_lea.vmem %s23_s11, 224  ;;  %p3992_p11 = scmp.lt.s32.totalorder %s23_s11, %s23_s11 }
  0x1b   :  { %p3988_p10 = scmp.ne.s32.totalorder %s23_s11, %s3987_s15  ;;  %p3993_p12 = scmp.lt.s32.totalorder %s3987_s15, %s3987_s15 }
  0x1d   :  { %p3994_p13 = por %p3993_p12, %p3992_p11 }
  0x1f   :  { %p3995_p0 = pnand %p3994_p13, %p3988_p10 }
  0x21   :  { %3998 = shalt.err (!%p3995_p0)
}
  0x22   :  { %25 = dma.hbm_to_vmem [thread:$0]  %s4230_s0, 224, %s23_s11, [#allocation3]  }
  0x23   :  { %s4072_s17 = smov [#allocation7]   ;;  %s4073_s19 = smov [#allocation10]  }
  0x24   :  { %s44_s18 = sshll.u32 %s4072_s17, 4  ;;  %s67_s20 = sshll.u32 %s4073_s19, 4  ;;  %s45_s18 = int_to_ptr.vmem [resolvable:$true] %s44_s18  ;;  %s68_s20 = int_to_ptr.vmem [resolvable:$true] %s67_s20 }
  0x25   :  { %s4007_s21 = scalar_lea.vmem %s45_s18, 64  ;;  %p4012_p2 = scmp.lt.s32.totalorder %s45_s18, %s45_s18 }
  0x26   :  { %p4008_p1 = scmp.ne.s32.totalorder %s45_s18, %s4007_s21  ;;  %p4013_p3 = scmp.lt.s32.totalorder %s4007_s21, %s4007_s21 }
  0x28   :  { %p4014_p4 = por %p4013_p3, %p4012_p2 }
  0x2a   :  { %p4015_p5 = pnand %p4014_p4, %p4008_p1 }
  0x2c   :  { %4018 = shalt.err (!%p4015_p5)
}
  0x2d   :  { %47 = dma.hbm_to_vmem [thread:$0]  %s4232_s2, 64, %s45_s18, [#allocation6]  }
  0x2e   :  { %s4027_s23 = scalar_lea.vmem %s68_s20, 4096  ;;  %p4032_p7 = scmp.lt.s32.totalorder %s68_s20, %s68_s20 }
  0x2f   :  { %p4028_p6 = scmp.ne.s32.totalorder %s68_s20, %s4027_s23  ;;  %p4033_p8 = scmp.lt.s32.totalorder %s4027_s23, %s4027_s23 }
  0x31   :  { %p4034_p9 = por %p4033_p8, %p4032_p7 }
  0x33   :  { %p4035_p10 = pnand %p4034_p9, %p4028_p6 }
  0x35   :  { %4038 = shalt.err (!%p4035_p10)
}
  0x36   :  { %s4074_s0 = smov 64   ;;  %s4075_s24 = smov 4  }
  0x37   :  { %73 = dma.hbm_to_vmem [thread:$0]  %s4235_s5, 4096, %s68_s20, [#allocation9], %s4074_s0, %s4074_s0, %s4075_s24  }
  0x38   :  { %4059 = dma.done.wait [#allocation3], 224  }
  0x39   :  { %4060 = vsyncadd [#allocation3], 4294967072 }
  0x3a   :  { %4061 = dma.done.wait [#allocation6], 25152  }
  0x3b   :  { %4062 = vsyncadd [#allocation6], 4294942144 }
  0x3c   :  { %4063 = dma.done.wait [#allocation9], 20480  }
  0x3d   :  { %4064 = vsyncadd [#allocation9], 4294946816  ;;  %v3419_v0 = vld [vmem:[#allocation5 + $0xe4] ss:$16 sps:$4 sm:$0xff]   ;;  %v3423_v2 = vld [vmem:[#allocation5 + $0xe0] ss:$16 sps:$4 sm:$0xff]   ;;  %v100_v38 = vlaneseq }
  0x3e   :  { %v3421_v1 = vld [vmem:[#allocation5 + $0x2e4] ss:$16 sps:$4 sm:$0xff]   ;;  %1345 = vmatprep.subr.bf16.mxu0 %v3419_v0  ;;  %v3424_v3 = vld [vmem:[#allocation5 + $0x2e0] ss:$16 sps:$4 sm:$0xff]   ;;  %v4076_v36 = vmov 1983009808  }
  0x3f   :  { %1386 = vmatprep.subr.bf16.mxu1 %v3421_v1  ;;  %v3425_v4 = vld [vmem:[#allocation5 + $0xc4] ss:$16 sps:$4 sm:$0xff]   ;;  %1346 = vmatpush1.bf16.msra.mxu0 %v3423_v2  ;;  %v3429_v6 = vld [vmem:[#allocation5 + $0xc0] ss:$16 sps:$4 sm:$0xff]   ;;  %v98_v37 = vunpack.c.l.s4 %v4076_v36  ;;  %v4134_v43 = vshrl.u32 %v100_v38, 7  ;;  %vm1341_vm0 = vcmask 130048  }
  0x40   :  { %1387 = vmatpush1.bf16.msra.mxu1 %v3424_v3  ;;  %v3427_v5 = vld [vmem:[#allocation5 + $0x2c4] ss:$16 sps:$4 sm:$0xff]   ;;  %1347 = vmatprep.subr.bf16.mxu0 %v3425_v4  ;;  %v3430_v7 = vld [vmem:[#allocation5 + $0x2c0] ss:$16 sps:$4 sm:$0xff]   ;;  %v3532_v36 = vld [vmem:[#allocation5 + $0xc8] ss:$16 sps:$4 sm:$0xff]  }
  0x41   :  { %1388 = vmatprep.subr.bf16.mxu1 %v3427_v5  ;;  %v3431_v8 = vld [vmem:[#allocation5 + $0xa4] ss:$16 sps:$4 sm:$0xff]   ;;  %v3435_v10 = vld [vmem:[#allocation5 + $0xa0] ss:$16 sps:$4 sm:$0xff]   ;;  %v99_v42 = vunpack.c.0.s8 %v98_v37  ;;  %v3540_v38 = vld [vmem:[#allocation5 + $0xac] ss:$16 sps:$4 sm:$0xff]  }
  0x42   :  { %v3433_v9 = vld [vmem:[#allocation5 + $0x2a4] ss:$16 sps:$4 sm:$0xff]   ;;  %v3436_v11 = vld [vmem:[#allocation5 + $0x2a0] ss:$16 sps:$4 sm:$0xff]   ;;  %s4078_s28 = smov [#allocation11]  }
  0x43   :  { %1348 = vmatpush1.bf16.msra.mxu0 %v3429_v6  ;;  %v3437_v12 = vld [vmem:[#allocation5 + $0x84] ss:$16 sps:$4 sm:$0xff]   ;;  %v3441_v14 = vld [vmem:[#allocation5 + $0x80] ss:$16 sps:$4 sm:$0xff]   ;;  %v4137_v49 = vsub.s32 %v99_v42, %v4134_v43  ;;  %v3546_v42 = vld [vmem:[#allocation5 + $0x8c] ss:$16 sps:$4 sm:$0xff]  }
  0x44   :  { %1389 = vmatpush1.bf16.msra.mxu1 %v3430_v7  ;;  %1349 = vmatprep.subr.bf16.mxu0 %v3431_v8  ;;  %v3439_v13 = vld [vmem:[#allocation5 + $0x284] ss:$16 sps:$4 sm:$0xff]   ;;  %v3442_v15 = vld [vmem:[#allocation5 + $0x280] ss:$16 sps:$4 sm:$0xff]   ;;  %s2993_s29 = sshll.u32 %s4078_s28, 4  ;;  %s2994_s29 = int_to_ptr.vmem [resolvable:$true] %s2993_s29 }
  0x45   :  { %1390 = vmatprep.subr.bf16.mxu1 %v3433_v9  ;;  %v3443_v16 = vld [vmem:[#allocation5 + $0x64] ss:$16 sps:$4 sm:$0xff]   ;;  %v3447_v18 = vld [vmem:[#allocation5 + $0x60] ss:$16 sps:$4 sm:$0xff]   ;;  %s4039_s30 = scalar_lea.vmem %s2994_s29, 32  ;;  %p4044_p12 = scmp.lt.s32.totalorder %s2994_s29, %s2994_s29 }
  0x46   :  { %v3445_v17 = vld [vmem:[#allocation5 + $0x264] ss:$16 sps:$4 sm:$0xff]   ;;  %v3448_v19 = vld [vmem:[#allocation5 + $0x260] ss:$16 sps:$4 sm:$0xff]   ;;  %p4040_p11 = scmp.ne.s32.totalorder %s2994_s29, %s4039_s30  ;;  %p4045_p13 = scmp.lt.s32.totalorder %s4039_s30, %s4039_s30 }
  0x47   :  { %1350 = vmatpush1.bf16.msra.mxu0 %v3435_v10  ;;  %v3449_v20 = vld [vmem:[#allocation5 + $0x44] ss:$16 sps:$4 sm:$0xff]   ;;  %v3453_v22 = vld [vmem:[#allocation5 + $0x40] ss:$16 sps:$4 sm:$0xff]  }
  0x48   :  { %1391 = vmatpush1.bf16.msra.mxu1 %v3436_v11  ;;  %1351 = vmatprep.subr.bf16.mxu0 %v3437_v12  ;;  %v3451_v21 = vld [vmem:[#allocation5 + $0x244] ss:$16 sps:$4 sm:$0xff]   ;;  %v3454_v23 = vld [vmem:[#allocation5 + $0x240] ss:$16 sps:$4 sm:$0xff]   ;;  %v93_v12 = vld [vmem:[#allocation2 + $0x8] sm:$0x3f]  ;;  %p4046_p0 = por %p4045_p13, %p4044_p12 }
  0x49   :  { %1392 = vmatprep.subr.bf16.mxu1 %v3439_v13  ;;  %v3455_v24 = vld [vmem:[#allocation5 + $0x24] ss:$16 sps:$4 sm:$0xff]   ;;  %v3459_v26 = vld [vmem:[#allocation5 + $0x20] ss:$16 sps:$4 sm:$0xff]   ;;  %v4148_v13 = vrot.slane %v93_v12, %v4137_v49 }
  0x4a   :  { %v3457_v25 = vld [vmem:[#allocation5 + $0x224] ss:$16 sps:$4 sm:$0xff]   ;;  %v3460_v27 = vld [vmem:[#allocation5 + $0x220] ss:$16 sps:$4 sm:$0xff]   ;;  %p4047_p1 = pnand %p4046_p0, %p4040_p11 }
  0x4b   :  { %1352 = vmatpush1.bf16.msra.mxu0 %v3441_v14  ;;  %v3461_v28 = vld [vmem:[#allocation5 + $0x4] ss:$16 sps:$4 sm:$0xff]   ;;  %v3465_v30 = vld [vmem:[#allocation5] ss:$16 sps:$4 sm:$0xff]  }
  0x4c   :  { %1393 = vmatpush1.bf16.msra.mxu1 %v3442_v15  ;;  %1353 = vmatprep.subr.bf16.mxu0 %v3443_v16  ;;  %v3463_v29 = vld [vmem:[#allocation5 + $0x204] ss:$16 sps:$4 sm:$0xff]   ;;  %v3466_v31 = vld [vmem:[#allocation5 + $0x200] ss:$16 sps:$4 sm:$0xff]  }
  0x4d   :  { %1394 = vmatprep.subr.bf16.mxu1 %v3445_v17  ;;  %v3467_v32 = vld [vmem:[#allocation5 + $0x1e4] ss:$16 sps:$4 sm:$0xff]   ;;  %v3471_v34 = vld [vmem:[#allocation5 + $0x1e0] ss:$16 sps:$4 sm:$0xff]  }
  0x4e   :  { %v3469_v33 = vld [vmem:[#allocation5 + $0x3e4] ss:$16 sps:$4 sm:$0xff]   ;;  %v3472_v35 = vld [vmem:[#allocation5 + $0x3e0] ss:$16 sps:$4 sm:$0xff]  }
  0x4f   :  { %1354 = vmatpush1.bf16.msra.mxu0 %v3447_v18  ;;  %v3473_v39 = vld [vmem:[#allocation5 + $0x1c4] ss:$16 sps:$4 sm:$0xff]   ;;  %v3477_v41 = vld [vmem:[#allocation5 + $0x1c0] ss:$16 sps:$4 sm:$0xff]   ;;  %v128_v18 = vcombine.high %v4148_v13, %v4148_v13 }
  0x50   :  { %1395 = vmatpush1.bf16.msra.mxu1 %v3448_v19  ;;  %1355 = vmatprep.subr.bf16.mxu0 %v3449_v20  ;;  %v3475_v40 = vld [vmem:[#allocation5 + $0x3c4] ss:$16 sps:$4 sm:$0xff]   ;;  %v3478_v44 = vld [vmem:[#allocation5 + $0x3c0] ss:$16 sps:$4 sm:$0xff]  }
  0x51   :  { %1396 = vmatprep.subr.bf16.mxu1 %v3451_v21  ;;  %v3479_v45 = vld [vmem:[#allocation5 + $0x1a4] ss:$16 sps:$4 sm:$0xff]   ;;  %v3483_v47 = vld [vmem:[#allocation5 + $0x1a0] ss:$16 sps:$4 sm:$0xff]   ;;  %v113_v21 = vcombine.high %v93_v12, %v93_v12  ;;  %v3594_v12 = vld [vmem:[#allocation5 + $0x18c] ss:$16 sps:$4 sm:$0xff]  }
  0x52   :  { %v3481_v46 = vld [vmem:[#allocation5 + $0x3a4] ss:$16 sps:$4 sm:$0xff]   ;;  %v3484_v48 = vld [vmem:[#allocation5 + $0x3a0] ss:$16 sps:$4 sm:$0xff]  }
  0x53   :  { %1356 = vmatpush1.bf16.msra.mxu0 %v3453_v22  ;;  %v3485_v50 = vld [vmem:[#allocation5 + $0x184] ss:$16 sps:$4 sm:$0xff]   ;;  %v3489_v53 = vld [vmem:[#allocation5 + $0x180] ss:$16 sps:$4 sm:$0xff]  }
  0x54   :  { %1397 = vmatpush1.bf16.msra.mxu1 %v3454_v23  ;;  %1357 = vmatprep.subr.bf16.mxu0 %v3455_v24  ;;  %v3487_v51 = vld [vmem:[#allocation5 + $0x384] ss:$16 sps:$4 sm:$0xff]   ;;  %v3490_v56 = vld [vmem:[#allocation5 + $0x380] ss:$16 sps:$4 sm:$0xff]  }
  0x55   :  { %1398 = vmatprep.subr.bf16.mxu1 %v3457_v25  ;;  %v92_v52 = vld [vmem:[#allocation2] sm:$0xff]  ;;  %v3527_v25 = vld [vmem:[#allocation5 + $0xec] ss:$16 sps:$4 sm:$0xff]  }
  0x56   :  { %v103_v54 = vrot.slane %v92_v52, %v4137_v49  ;;  %v96_v55 = vcombine.high %v92_v52, %v92_v52  ;;  %v3491_v57 = vld [vmem:[#allocation5 + $0x164] ss:$16 sps:$4 sm:$0xff]   ;;  %v3495_v61 = vld [vmem:[#allocation5 + $0x160] ss:$16 sps:$4 sm:$0xff]  }
  0x57   :  { %1358 = vmatpush1.bf16.msra.mxu0 %v3459_v26  ;;  %v3493_v58 = vld [vmem:[#allocation5 + $0x364] ss:$16 sps:$4 sm:$0xff]   ;;  %v3496_v0 = vld [vmem:[#allocation5 + $0x360] ss:$16 sps:$4 sm:$0xff]   ;;  %v4156_v26 = vpack.c.bf16 %v128_v18, %v128_v18 }
  0x58   :  { %1399 = vmatpush1.bf16.msra.mxu1 %v3460_v27  ;;  %1359 = vmatprep.subr.bf16.mxu0 %v3461_v28  ;;  %v111_v59 = vcombine.high %v103_v54, %v103_v54  ;;  %v110_v60 = vrot.slane %v96_v55, %v4137_v49  ;;  %v3497_v1 = vld [vmem:[#allocation5 + $0x144] ss:$16 sps:$4 sm:$0xff]   ;;  %v3501_v4 = vld [vmem:[#allocation5 + $0x140] ss:$16 sps:$4 sm:$0xff]   ;;  %v4152_v19 = vpack.c.bf16 %v103_v54, %v103_v54  ;;  %v3564_v55 = vld [vmem:[#allocation5 + $0x2c] ss:$16 sps:$4 sm:$0xff]  }
  0x59   :  { %1400 = vmatprep.subr.bf16.mxu1 %v3463_v29  ;;  %v3499_v2 = vld [vmem:[#allocation5 + $0x344] ss:$16 sps:$4 sm:$0xff]   ;;  %v3502_v5 = vld [vmem:[#allocation5 + $0x340] ss:$16 sps:$4 sm:$0xff]   ;;  %v127_v27 = vrot.slane %v113_v21, %v4137_v49  ;;  %v4077_v29 = vmov 0  }
  0x5a   :  { %v4141_v62 = vpack.c.bf16 %v111_v59, %v111_v59  ;;  %v112_v63 = vcombine.high %v110_v60, %v110_v60  ;;  %v3503_v6 = vld [vmem:[#allocation5 + $0x124] ss:$16 sps:$4 sm:$0xff]   ;;  %v3507_v8 = vld [vmem:[#allocation5 + $0x120] ss:$16 sps:$4 sm:$0xff]   ;;  %v4154_v20 = vpack.c.bf16 %v110_v60, %v110_v60  ;;  %v3550_v49 = vld [vmem:[#allocation5 + $0x68] ss:$16 sps:$4 sm:$0xff]  }
  0x5b   :  { %1360 = vmatpush1.bf16.msra.mxu0 %v3465_v30  ;;  %v3505_v7 = vld [vmem:[#allocation5 + $0x324] ss:$16 sps:$4 sm:$0xff]   ;;  %v3508_v9 = vld [vmem:[#allocation5 + $0x320] ss:$16 sps:$4 sm:$0xff]   ;;  %v3570_v59 = vld [vmem:[#allocation5 + $0xc] ss:$16 sps:$4 sm:$0xff]  }
  0x5c   :  { %1401 = vmatpush1.bf16.msra.mxu1 %v3466_v31  ;;  %1361 = vmatprep.subr.bf16.mxu0 %v3467_v32  ;;  %v4143_v3 = vpack.c.bf16 %v112_v63, %v112_v63  ;;  %v3509_v10 = vld [vmem:[#allocation5 + $0x104] ss:$16 sps:$4 sm:$0xff]   ;;  %v3513_v14 = vld [vmem:[#allocation5 + $0x100] ss:$16 sps:$4 sm:$0xff]   ;;  %v4163_v31 = vpack.c.bf16 %v127_v27, %v127_v27  ;;  %v3525_v32 = vld [vmem:[#allocation5 + $0xe8] ss:$16 sps:$4 sm:$0xff]  }
  0x5d   :  { %1402 = vmatprep.subr.bf16.mxu1 %v3469_v33  ;;  %1377 = vmatprep.mubr.bf16.mxu0 %v4141_v62  ;;  %v3511_v11 = vld [vmem:[#allocation5 + $0x304] ss:$16 sps:$4 sm:$0xff]   ;;  %v3514_v15 = vld [vmem:[#allocation5 + $0x300] ss:$16 sps:$4 sm:$0xff]   ;;  %v3576_v63 = vld [vmem:[#allocation5 + $0x1ec] ss:$16 sps:$4 sm:$0xff]  }
  0x5e   :  { %1418 = vmatprep.mubr.bf16.mxu1 %v4143_v3  ;;  %v3518_v16 = vld [vmem:[#allocation5 + $0x4e4] ss:$16 sps:$4 sm:$0xff]   ;;  %v3516_v22 = vld [vmem:[#allocation5 + $0x4e0] ss:$16 sps:$4 sm:$0xff]   ;;  %v3598_v21 = vld [vmem:[#allocation5 + $0x168] ss:$16 sps:$4 sm:$0xff]  }
  0x5f   :  { %1362 = vmatpush2.bf16.msra.mxu0 %v3471_v34  ;;  %v3521_v17 = vld [vmem:[#allocation5 + $0x604] ss:$16 sps:$4 sm:$0xff]   ;;  %v3519_v23 = vld [vmem:[#allocation5 + $0x600] ss:$16 sps:$4 sm:$0xff]   ;;  %v3534_v34 = vld [vmem:[#allocation5 + $0xcc] ss:$16 sps:$4 sm:$0xff]  }
  0x60   :  { %1403 = vmatpush2.bf16.msra.mxu1 %v3472_v35  ;;  %1363 = vmatprep.subr.bf16.mxu0 %v3473_v39  ;;  %v3524_v24 = vld [vmem:[#allocation5 + $0x4c4] ss:$16 sps:$4 sm:$0xff]   ;;  %v3522_v28 = vld [vmem:[#allocation5 + $0x4c0] ss:$16 sps:$4 sm:$0xff]  }
  0x61   :  { %1404 = vmatprep.subr.bf16.mxu1 %v3475_v40  ;;  %v3530_v30 = vld [vmem:[#allocation5 + $0x4a4] ss:$16 sps:$4 sm:$0xff]   ;;  %v3528_v33 = vld [vmem:[#allocation5 + $0x4a0] ss:$16 sps:$4 sm:$0xff]   ;;  %v3538_v40 = vld [vmem:[#allocation5 + $0xa8] ss:$16 sps:$4 sm:$0xff]  }
  0x62   :  { %v3537_v35 = vld [vmem:[#allocation5 + $0x484] ss:$16 sps:$4 sm:$0xff]   ;;  %v3535_v37 = vld [vmem:[#allocation5 + $0x480] ss:$16 sps:$4 sm:$0xff]  }
  0x63   :  { %1364 = vmatpush2.bf16.msra.mxu0 %v3477_v41  ;;  %v3543_v39 = vld [vmem:[#allocation5 + $0x464] ss:$16 sps:$4 sm:$0xff]   ;;  %v3541_v41 = vld [vmem:[#allocation5 + $0x460] ss:$16 sps:$4 sm:$0xff]  }
  0x64   :  { %1405 = vmatpush2.bf16.msra.mxu1 %v3478_v44  ;;  %1365 = vmatprep.subr.bf16.mxu0 %v3479_v45  ;;  %v3549_v44 = vld [vmem:[#allocation5 + $0x444] ss:$16 sps:$4 sm:$0xff]   ;;  %v3544_v45 = vld [vmem:[#allocation5 + $0x88] ss:$16 sps:$4 sm:$0xff]   ;;  %v3559_v54 = vld [vmem:[#allocation5 + $0x400] ss:$16 sps:$4 sm:$0xff]  }
  0x65   :  { %1406 = vmatprep.subr.bf16.mxu1 %v3481_v46  ;;  %v3547_v46 = vld [vmem:[#allocation5 + $0x440] ss:$16 sps:$4 sm:$0xff]   ;;  %v3561_v52 = vld [vmem:[#allocation5 + $0x404] ss:$16 sps:$4 sm:$0xff]  }
  0x66   :  { %v3573_v60 = vld [vmem:[#allocation5 + $0x5c4] ss:$16 sps:$4 sm:$0xff]   ;;  %v3607_v27 = vld [vmem:[#allocation5 + $0x500] ss:$16 sps:$4 sm:$0xff]  }
  0x67   :  { %1366 = vmatpush2.bf16.msra.mxu0 %v3483_v47  ;;  %v3552_v47 = vld [vmem:[#allocation5 + $0x6c] ss:$16 sps:$4 sm:$0xff]   ;;  %v3603_v18 = vld [vmem:[#allocation5 + $0x524] ss:$16 sps:$4 sm:$0xff]  }
  0x68   :  { %1407 = vmatpush2.bf16.msra.mxu1 %v3484_v48  ;;  %1367 = vmatprep.subr.bf16.mxu0 %v3485_v50  ;;  %v3555_v48 = vld [vmem:[#allocation5 + $0x424] ss:$16 sps:$4 sm:$0xff]   ;;  %v3553_v50 = vld [vmem:[#allocation5 + $0x420] ss:$16 sps:$4 sm:$0xff]  }
  0x69   :  { %1408 = vmatprep.subr.bf16.mxu1 %v3487_v51  ;;  %v3558_v51 = vld [vmem:[#allocation5 + $0x4c] ss:$16 sps:$4 sm:$0xff]  }
  0x6b   :  { %1368 = vmatpush2.bf16.msra.mxu0 %v3489_v53  ;;  %v3556_v53 = vld [vmem:[#allocation5 + $0x48] ss:$16 sps:$4 sm:$0xff]  }
  0x6c   :  { %1409 = vmatpush2.bf16.msra.mxu1 %v3490_v56  ;;  %1369 = vmatprep.subr.bf16.mxu0 %v3491_v57  ;;  %v3567_v56 = vld [vmem:[#allocation5 + $0x5e4] ss:$16 sps:$4 sm:$0xff]   ;;  %v3562_v57 = vld [vmem:[#allocation5 + $0x28] ss:$16 sps:$4 sm:$0xff]  }
  0x6d   :  { %1410 = vmatprep.subr.bf16.mxu1 %v3493_v58  ;;  %v3565_v58 = vld [vmem:[#allocation5 + $0x5e0] ss:$16 sps:$4 sm:$0xff]  }
  0x6f   :  { %1370 = vmatpush2.bf16.msra.mxu0 %v3495_v61  ;;  %v3568_v61 = vld [vmem:[#allocation5 + $0x8] ss:$16 sps:$4 sm:$0xff]  }
  0x70   :  { %1411 = vmatpush2.bf16.msra.mxu1 %v3496_v0  ;;  %1371 = vmatprep.subr.bf16.mxu0 %v3497_v1  ;;  %v3579_v0 = vld [vmem:[#allocation5 + $0x5a4] ss:$16 sps:$4 sm:$0xff]   ;;  %v3574_v1 = vld [vmem:[#allocation5 + $0x1e8] ss:$16 sps:$4 sm:$0xff]  }
  0x71   :  { %1412 = vmatprep.subr.bf16.mxu1 %v3499_v2  ;;  %v3577_v2 = vld [vmem:[#allocation5 + $0x5a0] ss:$16 sps:$4 sm:$0xff]  }
  0x73   :  { %1372 = vmatpush2.bf16.msra.mxu0 %v3501_v4  ;;  %v3582_v4 = vld [vmem:[#allocation5 + $0x1cc] ss:$16 sps:$4 sm:$0xff]  }
  0x74   :  { %1413 = vmatpush2.bf16.msra.mxu1 %v3502_v5  ;;  %1373 = vmatprep.subr.bf16.mxu0 %v3503_v6  ;;  %v3585_v5 = vld [vmem:[#allocation5 + $0x584] ss:$16 sps:$4 sm:$0xff]   ;;  %v3580_v6 = vld [vmem:[#allocation5 + $0x1c8] ss:$16 sps:$4 sm:$0xff]  }
  0x75   :  { %1414 = vmatprep.subr.bf16.mxu1 %v3505_v7  ;;  %v3583_v7 = vld [vmem:[#allocation5 + $0x580] ss:$16 sps:$4 sm:$0xff]  }
  0x77   :  { %1374 = vmatpush2.bf16.msra.mxu0 %v3507_v8  ;;  %v3588_v8 = vld [vmem:[#allocation5 + $0x1ac] ss:$16 sps:$4 sm:$0xff]  }
  0x78   :  { %1415 = vmatpush2.bf16.msra.mxu1 %v3508_v9  ;;  %1375 = vmatprep.subr.bf16.mxu0 %v3509_v10  ;;  %v3591_v9 = vld [vmem:[#allocation5 + $0x564] ss:$16 sps:$4 sm:$0xff]   ;;  %v3586_v10 = vld [vmem:[#allocation5 + $0x1a8] ss:$16 sps:$4 sm:$0xff]  }
  0x79   :  { %1416 = vmatprep.subr.bf16.mxu1 %v3511_v11  ;;  %v3589_v11 = vld [vmem:[#allocation5 + $0x560] ss:$16 sps:$4 sm:$0xff]  }
  0x7b   :  { %1376 = vmatpush2.bf16.msra.mxu0 %v3513_v14  ;;  %v3597_v14 = vld [vmem:[#allocation5 + $0x544] ss:$16 sps:$4 sm:$0xff]  }
  0x7c   :  { %1417 = vmatpush2.bf16.msra.mxu1 %v3514_v15  ;;  %1427 = vmatprep.subr.bf16.mxu0 %v3518_v16  ;;  %v3592_v15 = vld [vmem:[#allocation5 + $0x188] ss:$16 sps:$4 sm:$0xff]   ;;  %v3595_v16 = vld [vmem:[#allocation5 + $0x540] ss:$16 sps:$4 sm:$0xff]  }
  0x7d   :  { %1482 = vmatprep.subr.bf16.mxu1 %v3521_v17  ;;  %v3600_v17 = vld [vmem:[#allocation5 + $0x16c] ss:$16 sps:$4 sm:$0xff]  }
  0x7e   :  { %1378 = vmatmul.mubr.bf16.vlgmr.msra.gmra.mxu0 %v4152_v19 }
  0x7f   :  { %1419 = vmatmul.mubr.bf16.vlgmr.msra.gmra.mxu1 %v4154_v20  ;;  %1428 = vmatpush1.bf16.msra.mxu0 %v3516_v22  ;;  %v3601_v22 = vld [vmem:[#allocation5 + $0x520] ss:$16 sps:$4 sm:$0xff]  }
  0x80   :  { %1483 = vmatpush1.bf16.msra.mxu1 %v3519_v23  ;;  %1429 = vmatprep.subr.bf16.mxu0 %v3524_v24  ;;  %v3606_v23 = vld [vmem:[#allocation5 + $0x14c] ss:$16 sps:$4 sm:$0xff]   ;;  %v3609_v24 = vld [vmem:[#allocation5 + $0x504] ss:$16 sps:$4 sm:$0xff]  }
  0x81   :  { %1500 = vmatprep.mubr.bf16.mxu1 %v4077_v29  ;;  %1509 = vmatprep.subr.bf16.mxu1 %v3527_v25  ;;  %v3604_v25 = vld [vmem:[#allocation5 + $0x148] ss:$16 sps:$4 sm:$0xff]  }
  0x82   :  { %1459 = vmatprep.mubr.bf16.mxu0 %v4156_v26 }
  0x83   :  { %1430 = vmatpush1.bf16.msra.mxu0 %v3522_v28  ;;  %v3612_v28 = vld [vmem:[#allocation5 + $0x12c] ss:$16 sps:$4 sm:$0xff]  }
  0x84   :  { %1431 = vmatprep.subr.bf16.mxu0 %v3530_v30  ;;  %v3615_v30 = vld [vmem:[#allocation5 + $0x2ec] ss:$16 sps:$4 sm:$0xff]  }
  0x87   :  { %3200 = vmatmul.mubr.msk.bf16.vlgmr.msra.gmra.mxu1 %vm1341_vm0, %v4163_v31  ;;  %1432 = vmatpush1.bf16.msra.mxu0 %v3528_v33  ;;  %v3610_v33 = vld [vmem:[#allocation5 + $0x128] ss:$16 sps:$4 sm:$0xff]  }
  0x88   :  { %1510 = vmatpush1.bf16.msra.mxu1 %v3525_v32  ;;  %1433 = vmatprep.subr.bf16.mxu0 %v3537_v35  ;;  %v4170_v32 = vpack.c.bf16 %v4148_v13, %v4148_v13  ;;  %v3618_v35 = vld [vmem:[#allocation5 + $0x10c] ss:$16 sps:$4 sm:$0xff]   ;;  %v3622_v13 = vld [vmem:[#allocation5 + $0x4e8] ss:$16 sps:$4 sm:$0xff]  }
  0x89   :  { %1511 = vmatprep.subr.bf16.mxu1 %v3534_v34  ;;  %1541 = vmatprep.mubr.bf16.mxu1 %v4141_v62  ;;  %v3571_v62 = vld [vmem:[#allocation5 + $0x5c0] ss:$16 sps:$4 sm:$0xff]   ;;  %v3613_v34 = vld [vmem:[#allocation5 + $0x2e8] ss:$16 sps:$4 sm:$0xff]  }
  0x8b   :  { %1434 = vmatpush1.bf16.msra.mxu0 %v3535_v37  ;;  %v3616_v37 = vld [vmem:[#allocation5 + $0x108] ss:$16 sps:$4 sm:$0xff]  }
  0x8c   :  { %1512 = vmatpush1.bf16.msra.mxu1 %v3532_v36  ;;  %1435 = vmatprep.subr.bf16.mxu0 %v3543_v39  ;;  %v3621_v36 = vld [vmem:[#allocation5 + $0x2cc] ss:$16 sps:$4 sm:$0xff]  }
  0x8d   :  { %1513 = vmatprep.subr.bf16.mxu1 %v3540_v38  ;;  %v3619_v38 = vld [vmem:[#allocation5 + $0x2c8] ss:$16 sps:$4 sm:$0xff]   ;;  %v3624_v39 = vld [vmem:[#allocation5 + $0x4ec] ss:$16 sps:$4 sm:$0xff]  }
  0x8f   :  { %1436 = vmatpush1.bf16.msra.mxu0 %v3541_v41  ;;  %v3625_v41 = vld [vmem:[#allocation5 + $0x2a8] ss:$16 sps:$4 sm:$0xff]  }
  0x90   :  { %1514 = vmatpush1.bf16.msra.mxu1 %v3538_v40  ;;  %1437 = vmatprep.subr.bf16.mxu0 %v3549_v44  ;;  %v3627_v40 = vld [vmem:[#allocation5 + $0x2ac] ss:$16 sps:$4 sm:$0xff]  }
  0x91   :  { %1515 = vmatprep.subr.bf16.mxu1 %v3546_v42  ;;  %v3630_v42 = vld [vmem:[#allocation5 + $0x4cc] ss:$16 sps:$4 sm:$0xff]  }
  0x92   :  { %v3633_v44 = vld [vmem:[#allocation5 + $0x28c] ss:$16 sps:$4 sm:$0xff]  }
  0x93   :  { %1438 = vmatpush1.bf16.msra.mxu0 %v3547_v46  ;;  %v3631_v46 = vld [vmem:[#allocation5 + $0x288] ss:$16 sps:$4 sm:$0xff]  }
  0x94   :  { %1516 = vmatpush1.bf16.msra.mxu1 %v3544_v45  ;;  %1439 = vmatprep.subr.bf16.mxu0 %v3555_v48  ;;  %v3628_v45 = vld [vmem:[#allocation5 + $0x4c8] ss:$16 sps:$4 sm:$0xff]   ;;  %v3639_v48 = vld [vmem:[#allocation5 + $0x26c] ss:$16 sps:$4 sm:$0xff]  }
  0x95   :  { %1517 = vmatprep.subr.bf16.mxu1 %v3552_v47  ;;  %v3636_v47 = vld [vmem:[#allocation5 + $0x4ac] ss:$16 sps:$4 sm:$0xff]  }
  0x97   :  { %1440 = vmatpush1.bf16.msra.mxu0 %v3553_v50  ;;  %v3637_v50 = vld [vmem:[#allocation5 + $0x268] ss:$16 sps:$4 sm:$0xff]  }
  0x98   :  { %1518 = vmatpush1.bf16.msra.mxu1 %v3550_v49  ;;  %1441 = vmatprep.subr.bf16.mxu0 %v3561_v52  ;;  %v3634_v49 = vld [vmem:[#allocation5 + $0x4a8] ss:$16 sps:$4 sm:$0xff]  }
  0x99   :  { %1519 = vmatprep.subr.bf16.mxu1 %v3558_v51  ;;  %v3645_v51 = vld [vmem:[#allocation5 + $0x24c] ss:$16 sps:$4 sm:$0xff]   ;;  %v3640_v52 = vld [vmem:[#allocation5 + $0x488] ss:$16 sps:$4 sm:$0xff]  }
  0x9b   :  { %1442 = vmatpush1.bf16.msra.mxu0 %v3559_v54  ;;  %v3651_v54 = vld [vmem:[#allocation5 + $0x22c] ss:$16 sps:$4 sm:$0xff]  }
  0x9c   :  { %1520 = vmatpush1.bf16.msra.mxu1 %v3556_v53  ;;  %1443 = vmatprep.subr.bf16.mxu0 %v3567_v56  ;;  %v3648_v53 = vld [vmem:[#allocation5 + $0x46c] ss:$16 sps:$4 sm:$0xff]   ;;  %v3649_v56 = vld [vmem:[#allocation5 + $0x228] ss:$16 sps:$4 sm:$0xff]  }
  0x9d   :  { %1521 = vmatprep.subr.bf16.mxu1 %v3564_v55  ;;  %v3646_v55 = vld [vmem:[#allocation5 + $0x468] ss:$16 sps:$4 sm:$0xff]  }
  0x9f   :  { %1444 = vmatpush2.bf16.msra.mxu0 %v3565_v58  ;;  %v3652_v58 = vld [vmem:[#allocation5 + $0x448] ss:$16 sps:$4 sm:$0xff]  }
  0xa0   :  { %1522 = vmatpush1.bf16.msra.mxu1 %v3562_v57  ;;  %1445 = vmatprep.subr.bf16.mxu0 %v3573_v60  ;;  %v3657_v57 = vld [vmem:[#allocation5 + $0x20c] ss:$16 sps:$4 sm:$0xff]  }
  0xa1   :  { %1523 = vmatprep.subr.bf16.mxu1 %v3570_v59  ;;  %v3655_v59 = vld [vmem:[#allocation5 + $0x208] ss:$16 sps:$4 sm:$0xff]   ;;  %v3660_v60 = vld [vmem:[#allocation5 + $0x42c] ss:$16 sps:$4 sm:$0xff]  }
  0xa3   :  { %1446 = vmatpush2.bf16.msra.mxu0 %v3571_v62  ;;  %v3658_v62 = vld [vmem:[#allocation5 + $0x428] ss:$16 sps:$4 sm:$0xff]  }
  0xa4   :  { %1524 = vmatpush1.bf16.msra.mxu1 %v3568_v61  ;;  %1447 = vmatprep.subr.bf16.mxu0 %v3579_v0  ;;  %v3663_v61 = vld [vmem:[#allocation5 + $0x3ec] ss:$16 sps:$4 sm:$0xff]  }
  0xa5   :  { %1525 = vmatprep.subr.bf16.mxu1 %v3576_v63  ;;  %v3661_v63 = vld [vmem:[#allocation5 + $0x3e8] ss:$16 sps:$4 sm:$0xff]   ;;  %v3666_v0 = vld [vmem:[#allocation5 + $0x40c] ss:$16 sps:$4 sm:$0xff]  }
  0xa7   :  { %1448 = vmatpush2.bf16.msra.mxu0 %v3577_v2  ;;  %v3664_v2 = vld [vmem:[#allocation5 + $0x408] ss:$16 sps:$4 sm:$0xff]  }
  0xa8   :  { %1526 = vmatpush2.bf16.msra.mxu1 %v3574_v1  ;;  %1449 = vmatprep.subr.bf16.mxu0 %v3585_v5  ;;  %v3669_v1 = vld [vmem:[#allocation5 + $0x3cc] ss:$16 sps:$4 sm:$0xff]  }
  0xa9   :  { %1527 = vmatprep.subr.bf16.mxu1 %v3582_v4  ;;  %v3667_v4 = vld [vmem:[#allocation5 + $0x3c8] ss:$16 sps:$4 sm:$0xff]   ;;  %v3672_v5 = vld [vmem:[#allocation5 + $0x5ec] ss:$16 sps:$4 sm:$0xff]  }
  0xab   :  { %1450 = vmatpush2.bf16.msra.mxu0 %v3583_v7  ;;  %v3670_v7 = vld [vmem:[#allocation5 + $0x5e8] ss:$16 sps:$4 sm:$0xff]  }
  0xac   :  { %1528 = vmatpush2.bf16.msra.mxu1 %v3580_v6  ;;  %1451 = vmatprep.subr.bf16.mxu0 %v3591_v9  ;;  %v3675_v6 = vld [vmem:[#allocation5 + $0x3ac] ss:$16 sps:$4 sm:$0xff]  }
  0xad   :  { %1529 = vmatprep.subr.bf16.mxu1 %v3588_v8  ;;  %v3673_v8 = vld [vmem:[#allocation5 + $0x3a8] ss:$16 sps:$4 sm:$0xff]   ;;  %v3678_v9 = vld [vmem:[#allocation5 + $0x5cc] ss:$16 sps:$4 sm:$0xff]  }
  0xaf   :  { %1452 = vmatpush2.bf16.msra.mxu0 %v3589_v11  ;;  %v3676_v11 = vld [vmem:[#allocation5 + $0x5c8] ss:$16 sps:$4 sm:$0xff]  }
  0xb0   :  { %1530 = vmatpush2.bf16.msra.mxu1 %v3586_v10  ;;  %1453 = vmatprep.subr.bf16.mxu0 %v3597_v14  ;;  %v3681_v10 = vld [vmem:[#allocation5 + $0x38c] ss:$16 sps:$4 sm:$0xff]  }
  0xb1   :  { %1531 = vmatprep.subr.bf16.mxu1 %v3594_v12  ;;  %v3679_v12 = vld [vmem:[#allocation5 + $0x388] ss:$16 sps:$4 sm:$0xff]   ;;  %v3684_v14 = vld [vmem:[#allocation5 + $0x5ac] ss:$16 sps:$4 sm:$0xff]  }
  0xb3   :  { %1454 = vmatpush2.bf16.msra.mxu0 %v3595_v16  ;;  %v3682_v16 = vld [vmem:[#allocation5 + $0x5a8] ss:$16 sps:$4 sm:$0xff]  }
  0xb4   :  { %1532 = vmatpush2.bf16.msra.mxu1 %v3592_v15  ;;  %1455 = vmatprep.subr.bf16.mxu0 %v3603_v18  ;;  %v3687_v15 = vld [vmem:[#allocation5 + $0x36c] ss:$16 sps:$4 sm:$0xff]  }
  0xb5   :  { %1533 = vmatprep.subr.bf16.mxu1 %v3600_v17  ;;  %v3685_v17 = vld [vmem:[#allocation5 + $0x368] ss:$16 sps:$4 sm:$0xff]   ;;  %v3690_v18 = vld [vmem:[#allocation5 + $0x58c] ss:$16 sps:$4 sm:$0xff]  }
  0xb7   :  { %1456 = vmatpush2.bf16.msra.mxu0 %v3601_v22  ;;  %v3688_v22 = vld [vmem:[#allocation5 + $0x588] ss:$16 sps:$4 sm:$0xff]  }
  0xb8   :  { %1534 = vmatpush2.bf16.msra.mxu1 %v3598_v21  ;;  %1457 = vmatprep.subr.bf16.mxu0 %v3609_v24  ;;  %v3693_v21 = vld [vmem:[#allocation5 + $0x34c] ss:$16 sps:$4 sm:$0xff]  }
  0xb9   :  { %1535 = vmatprep.subr.bf16.mxu1 %v3606_v23  ;;  %v3691_v23 = vld [vmem:[#allocation5 + $0x348] ss:$16 sps:$4 sm:$0xff]   ;;  %v3696_v24 = vld [vmem:[#allocation5 + $0x56c] ss:$16 sps:$4 sm:$0xff]  }
  0xbb   :  { %1458 = vmatpush2.bf16.msra.mxu0 %v3607_v27  ;;  %v3694_v27 = vld [vmem:[#allocation5 + $0x568] ss:$16 sps:$4 sm:$0xff]  }
  0xbc   :  { %1536 = vmatpush2.bf16.msra.mxu1 %v3604_v25  ;;  %1550 = vmatprep.subr.bf16.mxu0 %v3615_v30  ;;  %v3699_v25 = vld [vmem:[#allocation5 + $0x32c] ss:$16 sps:$4 sm:$0xff]  }
  0xbd   :  { %1537 = vmatprep.subr.bf16.mxu1 %v3612_v28  ;;  %v3697_v28 = vld [vmem:[#allocation5 + $0x328] ss:$16 sps:$4 sm:$0xff]   ;;  %v3702_v30 = vld [vmem:[#allocation5 + $0x54c] ss:$16 sps:$4 sm:$0xff]  }
  0xbe   :  { %1460 = vmatmul.mubr.bf16.vlgmr.msra.gmra.mxu0 %v4170_v32 }
  0xbf   :  { %1551 = vmatpush1.bf16.msra.mxu0 %v3613_v34  ;;  %1582 = vmatprep.mubr.bf16.mxu0 %v4143_v3  ;;  %v3642_v3 = vld [vmem:[#allocation5 + $0x48c] ss:$16 sps:$4 sm:$0xff]   ;;  %v3700_v34 = vld [vmem:[#allocation5 + $0x548] ss:$16 sps:$4 sm:$0xff]  }
  0xc0   :  { %1538 = vmatpush2.bf16.msra.mxu1 %v3610_v33  ;;  %1552 = vmatprep.subr.bf16.mxu0 %v3621_v36  ;;  %v3705_v33 = vld [vmem:[#allocation5 + $0x30c] ss:$16 sps:$4 sm:$0xff]  }
  0xc1   :  { %1539 = vmatprep.subr.bf16.mxu1 %v3618_v35  ;;  %v3703_v35 = vld [vmem:[#allocation5 + $0x308] ss:$16 sps:$4 sm:$0xff]   ;;  %v3708_v36 = vld [vmem:[#allocation5 + $0x52c] ss:$16 sps:$4 sm:$0xff]  }
  0xc3   :  { %1553 = vmatpush1.bf16.msra.mxu0 %v3619_v38  ;;  %v3706_v38 = vld [vmem:[#allocation5 + $0x528] ss:$16 sps:$4 sm:$0xff]  }
  0xc4   :  { %1540 = vmatpush2.bf16.msra.mxu1 %v3616_v37  ;;  %1554 = vmatprep.subr.bf16.mxu0 %v3627_v40  ;;  %v3711_v37 = vld [vmem:[#allocation5 + $0x60c] ss:$16 sps:$4 sm:$0xff]  }
  0xc5   :  { %1591 = vmatprep.subr.bf16.mxu1 %v3624_v39  ;;  %v3709_v39 = vld [vmem:[#allocation5 + $0x608] ss:$16 sps:$4 sm:$0xff]   ;;  %v3714_v40 = vld [vmem:[#allocation5 + $0x50c] ss:$16 sps:$4 sm:$0xff]  }
  0xc7   :  { %1542 = vmatmul.mubr.bf16.vlgmr.msra.gmra.mxu1 %v4152_v19  ;;  %1555 = vmatpush1.bf16.msra.mxu0 %v3625_v41  ;;  %v3643_v19 = vld [vmem:[#allocation5 + $0x248] ss:$16 sps:$4 sm:$0xff]  }
  0xc8   :  { %1592 = vmatpush1.bf16.msra.mxu1 %v3622_v13  ;;  %1556 = vmatprep.subr.bf16.mxu0 %v3633_v44  ;;  %v3717_v13 = vld [vmem:[#allocation8 + $0xe4] ss:$16 sps:$4 sm:$0xff]  }
  0xc9   :  { %1593 = vmatprep.subr.bf16.mxu1 %v3630_v42  ;;  %1623 = vmatprep.mubr.bf16.mxu1 %v4156_v26  ;;  %v3654_v26 = vld [vmem:[#allocation5 + $0x44c] ss:$16 sps:$4 sm:$0xff]   ;;  %v3712_v41 = vld [vmem:[#allocation5 + $0x508] ss:$16 sps:$4 sm:$0xff]   ;;  %v3715_v42 = vld [vmem:[#allocation8 + $0xe0] ss:$16 sps:$4 sm:$0xff]  }
  0xca   :  { %v3720_v44 = vld [vmem:[#allocation8 + $0xc4] ss:$16 sps:$4 sm:$0xff]  }
  0xcb   :  { %1557 = vmatpush1.bf16.msra.mxu0 %v3631_v46  ;;  %v3723_v46 = vld [vmem:[#allocation8 + $0xa4] ss:$16 sps:$4 sm:$0xff]  }
  0xcc   :  { %1594 = vmatpush1.bf16.msra.mxu1 %v3628_v45  ;;  %1558 = vmatprep.subr.bf16.mxu0 %v3639_v48  ;;  %v3718_v45 = vld [vmem:[#allocation8 + $0xc0] ss:$16 sps:$4 sm:$0xff]  }
  0xcd   :  { %1595 = vmatprep.subr.bf16.mxu1 %v3636_v47  ;;  %v3726_v47 = vld [vmem:[#allocation8 + $0x84] ss:$16 sps:$4 sm:$0xff]   ;;  %v3724_v48 = vld [vmem:[#allocation8 + $0x80] ss:$16 sps:$4 sm:$0xff]  }
  0xcf   :  { %1559 = vmatpush1.bf16.msra.mxu0 %v3637_v50  ;;  %v3729_v50 = vld [vmem:[#allocation8 + $0x64] ss:$16 sps:$4 sm:$0xff]  }
  0xd0   :  { %1596 = vmatpush1.bf16.msra.mxu1 %v3634_v49  ;;  %1560 = vmatprep.subr.bf16.mxu0 %v3645_v51  ;;  %v3771_v49 = vld [vmem:[#allocation8 + $0x2e4] ss:$16 sps:$4 sm:$0xff]  }
  0xd1   :  { %1597 = vmatprep.subr.bf16.mxu1 %v3642_v3  ;;  %v3775_v3 = vld [vmem:[#allocation8 + $0x2c0] ss:$16 sps:$4 sm:$0xff]   ;;  %v3777_v51 = vld [vmem:[#allocation8 + $0x2c4] ss:$16 sps:$4 sm:$0xff]  }
  0xd3   :  { %1561 = vmatpush1.bf16.msra.mxu0 %v3643_v19  ;;  %v3781_v19 = vld [vmem:[#allocation8 + $0x2a0] ss:$16 sps:$4 sm:$0xff]  }
  0xd4   :  { %1598 = vmatpush1.bf16.msra.mxu1 %v3640_v52  ;;  %1562 = vmatprep.subr.bf16.mxu0 %v3651_v54  ;;  %v3730_v52 = vld [vmem:[#allocation8 + $0x40] ss:$16 sps:$4 sm:$0xff]   ;;  %v3735_v54 = vld [vmem:[#allocation8 + $0x24] ss:$16 sps:$4 sm:$0xff]  }
  0xd5   :  { %1599 = vmatprep.subr.bf16.mxu1 %v3648_v53  ;;  %v3783_v53 = vld [vmem:[#allocation8 + $0x2a4] ss:$16 sps:$4 sm:$0xff]  }
  0xd7   :  { %1563 = vmatpush1.bf16.msra.mxu0 %v3649_v56  ;;  %v3787_v56 = vld [vmem:[#allocation8 + $0x280] ss:$16 sps:$4 sm:$0xff]  }
  0xd8   :  { %1600 = vmatpush1.bf16.msra.mxu1 %v3646_v55  ;;  %1564 = vmatprep.subr.bf16.mxu0 %v3657_v57  ;;  %v3733_v55 = vld [vmem:[#allocation8 + $0x20] ss:$16 sps:$4 sm:$0xff]   ;;  %v3738_v57 = vld [vmem:[#allocation8 + $0x4] ss:$16 sps:$4 sm:$0xff]  }
  0xd9   :  { %1601 = vmatprep.subr.bf16.mxu1 %v3654_v26  ;;  %v3789_v26 = vld [vmem:[#allocation8 + $0x284] ss:$16 sps:$4 sm:$0xff]  }
  0xdb   :  { %1565 = vmatpush1.bf16.msra.mxu0 %v3655_v59  ;;  %v3793_v59 = vld [vmem:[#allocation8 + $0x260] ss:$16 sps:$4 sm:$0xff]  }
  0xdc   :  { %1602 = vmatpush1.bf16.msra.mxu1 %v3652_v58  ;;  %1566 = vmatprep.subr.bf16.mxu0 %v3663_v61  ;;  %v3736_v58 = vld [vmem:[#allocation8] ss:$16 sps:$4 sm:$0xff]   ;;  %v3741_v61 = vld [vmem:[#allocation8 + $0x1e4] ss:$16 sps:$4 sm:$0xff]  }
  0xdd   :  { %1603 = vmatprep.subr.bf16.mxu1 %v3660_v60  ;;  %v3795_v60 = vld [vmem:[#allocation8 + $0x264] ss:$16 sps:$4 sm:$0xff]  }
  0xdf   :  { %1567 = vmatpush2.bf16.msra.mxu0 %v3661_v63  ;;  %v3799_v63 = vld [vmem:[#allocation8 + $0x240] ss:$16 sps:$4 sm:$0xff]  }
  0xe0   :  { %1604 = vmatpush1.bf16.msra.mxu1 %v3658_v62  ;;  %1568 = vmatprep.subr.bf16.mxu0 %v3669_v1  ;;  %v3739_v62 = vld [vmem:[#allocation8 + $0x1e0] ss:$16 sps:$4 sm:$0xff]   ;;  %v3744_v1 = vld [vmem:[#allocation8 + $0x1c4] ss:$16 sps:$4 sm:$0xff]  }
  0xe1   :  { %1605 = vmatprep.subr.bf16.mxu1 %v3666_v0  ;;  %v3801_v0 = vld [vmem:[#allocation8 + $0x244] ss:$16 sps:$4 sm:$0xff]  }
  0xe3   :  { %1569 = vmatpush2.bf16.msra.mxu0 %v3667_v4  ;;  %v3805_v4 = vld [vmem:[#allocation8 + $0x220] ss:$16 sps:$4 sm:$0xff]  }
  0xe4   :  { %1606 = vmatpush1.bf16.msra.mxu1 %v3664_v2  ;;  %1570 = vmatprep.subr.bf16.mxu0 %v3675_v6  ;;  %v3742_v2 = vld [vmem:[#allocation8 + $0x1c0] ss:$16 sps:$4 sm:$0xff]   ;;  %v3747_v6 = vld [vmem:[#allocation8 + $0x1a4] ss:$16 sps:$4 sm:$0xff]  }
  0xe5   :  { %1607 = vmatprep.subr.bf16.mxu1 %v3672_v5  ;;  %v3807_v5 = vld [vmem:[#allocation8 + $0x224] ss:$16 sps:$4 sm:$0xff]  }
  0xe7   :  { %1571 = vmatpush2.bf16.msra.mxu0 %v3673_v8  ;;  %v3811_v8 = vld [vmem:[#allocation8 + $0x200] ss:$16 sps:$4 sm:$0xff]  }
  0xe8   :  { %1608 = vmatpush2.bf16.msra.mxu1 %v3670_v7  ;;  %1572 = vmatprep.subr.bf16.mxu0 %v3681_v10  ;;  %v3745_v7 = vld [vmem:[#allocation8 + $0x1a0] ss:$16 sps:$4 sm:$0xff]   ;;  %v3750_v10 = vld [vmem:[#allocation8 + $0x184] ss:$16 sps:$4 sm:$0xff]  }
  0xe9   :  { %1609 = vmatprep.subr.bf16.mxu1 %v3678_v9  ;;  %v3813_v9 = vld [vmem:[#allocation8 + $0x204] ss:$16 sps:$4 sm:$0xff]  }
  0xeb   :  { %1573 = vmatpush2.bf16.msra.mxu0 %v3679_v12  ;;  %v3817_v12 = vld [vmem:[#allocation8 + $0x3e0] ss:$16 sps:$4 sm:$0xff]  }
  0xec   :  { %1610 = vmatpush2.bf16.msra.mxu1 %v3676_v11  ;;  %1574 = vmatprep.subr.bf16.mxu0 %v3687_v15  ;;  %v3748_v11 = vld [vmem:[#allocation8 + $0x180] ss:$16 sps:$4 sm:$0xff]   ;;  %v3753_v15 = vld [vmem:[#allocation8 + $0x164] ss:$16 sps:$4 sm:$0xff]  }
  0xed   :  { %1611 = vmatprep.subr.bf16.mxu1 %v3684_v14  ;;  %v3819_v14 = vld [vmem:[#allocation8 + $0x3e4] ss:$16 sps:$4 sm:$0xff]  }
  0xef   :  { %1575 = vmatpush2.bf16.msra.mxu0 %v3685_v17  ;;  %v3823_v17 = vld [vmem:[#allocation8 + $0x3c0] ss:$16 sps:$4 sm:$0xff]  }
  0xf0   :  { %1612 = vmatpush2.bf16.msra.mxu1 %v3682_v16  ;;  %1576 = vmatprep.subr.bf16.mxu0 %v3693_v21  ;;  %v3751_v16 = vld [vmem:[#allocation8 + $0x160] ss:$16 sps:$4 sm:$0xff]   ;;  %v3756_v21 = vld [vmem:[#allocation8 + $0x144] ss:$16 sps:$4 sm:$0xff]  }
  0xf1   :  { %1613 = vmatprep.subr.bf16.mxu1 %v3690_v18  ;;  %v3825_v18 = vld [vmem:[#allocation8 + $0x3c4] ss:$16 sps:$4 sm:$0xff]  }
  0xf3   :  { %1577 = vmatpush2.bf16.msra.mxu0 %v3691_v23  ;;  %v3829_v23 = vld [vmem:[#allocation8 + $0x3a0] ss:$16 sps:$4 sm:$0xff]  }
  0xf4   :  { %1614 = vmatpush2.bf16.msra.mxu1 %v3688_v22  ;;  %1578 = vmatprep.subr.bf16.mxu0 %v3699_v25  ;;  %v3754_v22 = vld [vmem:[#allocation8 + $0x140] ss:$16 sps:$4 sm:$0xff]   ;;  %v3759_v25 = vld [vmem:[#allocation8 + $0x124] ss:$16 sps:$4 sm:$0xff]  }
  0xf5   :  { %1615 = vmatprep.subr.bf16.mxu1 %v3696_v24  ;;  %v3831_v24 = vld [vmem:[#allocation8 + $0x3a4] ss:$16 sps:$4 sm:$0xff]  }
  0xf7   :  { %1579 = vmatpush2.bf16.msra.mxu0 %v3697_v28  ;;  %v3835_v28 = vld [vmem:[#allocation8 + $0x380] ss:$16 sps:$4 sm:$0xff]  }
  0xf8   :  { %1616 = vmatpush2.bf16.msra.mxu1 %v3694_v27  ;;  %1580 = vmatprep.subr.bf16.mxu0 %v3705_v33  ;;  %v3757_v27 = vld [vmem:[#allocation8 + $0x120] ss:$16 sps:$4 sm:$0xff]   ;;  %v3762_v33 = vld [vmem:[#allocation8 + $0x104] ss:$16 sps:$4 sm:$0xff]  }
  0xf9   :  { %1617 = vmatprep.subr.bf16.mxu1 %v3702_v30  ;;  %v3837_v30 = vld [vmem:[#allocation8 + $0x384] ss:$16 sps:$4 sm:$0xff]  }
  0xfb   :  { %1581 = vmatpush2.bf16.msra.mxu0 %v3703_v35 }
  0xfc   :  { %1618 = vmatpush2.bf16.msra.mxu1 %v3700_v34  ;;  %1646 = vmatprep.subr.bf16.mxu0 %v3711_v37  ;;  %v3843_v37 = vld [vmem:[#allocation8 + $0x364] ss:$16 sps:$4 sm:$0xff]  }
  0xfd   :  { %1619 = vmatprep.subr.bf16.mxu1 %v3708_v36  ;;  %v3760_v36 = vld [vmem:[#allocation8 + $0x100] ss:$16 sps:$4 sm:$0xff]  }
  0xfe   :  { %1583 = vmatmul.mubr.bf16.vlgmr.msra.gmra.mxu0 %v4154_v20  ;;  %v3721_v20 = vld [vmem:[#allocation8 + $0xa0] ss:$16 sps:$4 sm:$0xff]  }
  0xff   :  { %1647 = vmatpush1.bf16.msra.mxu0 %v3709_v39  ;;  %1664 = vmatprep.mubr.bf16.mxu0 %v4077_v29  ;;  %v3769_v29 = vld [vmem:[#allocation8 + $0x2e0] ss:$16 sps:$4 sm:$0xff]  }
 0x100   :  { %1620 = vmatpush2.bf16.msra.mxu1 %v3706_v38  ;;  %2471 = vmatprep.subr.bf16.mxu0 %v3717_v13  ;;  %v3841_v13 = vld [vmem:[#allocation8 + $0x360] ss:$16 sps:$4 sm:$0xff]  }
 0x101   :  { %1621 = vmatprep.subr.bf16.mxu1 %v3714_v40  ;;  %v3765_v40 = vld [vmem:[#allocation8 + $0xec] ss:$16 sps:$4 sm:$0xff]  }
 0x104   :  { %1622 = vmatpush2.bf16.msra.mxu1 %v3712_v41 }
 0x105   :  { %2512 = vmatprep.subr.bf16.mxu1 %v3771_v49  ;;  %v3853_v49 = vld [vmem:[#allocation8 + $0x320] ss:$16 sps:$4 sm:$0xff]  }
 0x106   :  { %3201 = vmatmul.mubr.msk.bf16.vlgmr.msra.gmra.mxu0 %vm1341_vm0, %v4163_v31  ;;  %v3732_v31 = vld [vmem:[#allocation8 + $0x44] ss:$16 sps:$4 sm:$0xff]  }
 0x107   :  { %1624 = vmatmul.mubr.bf16.vlgmr.msra.gmra.mxu1 %v4170_v32  ;;  %2472 = vmatpush1.bf16.msra.mxu0 %v3715_v42  ;;  %v3727_v32 = vld [vmem:[#allocation8 + $0x60] ss:$16 sps:$4 sm:$0xff]  }
 0x108   :  { %2473 = vmatprep.subr.bf16.mxu0 %v3720_v44  ;;  %2513 = vmatpush1.bf16.msra.mxu1 %v3769_v29  ;;  %v3849_v44 = vld [vmem:[#allocation8 + $0x344] ss:$16 sps:$4 sm:$0xff]  }
 0x109   :  { %2514 = vmatprep.subr.bf16.mxu1 %v3777_v51  ;;  %v3856_v51 = vld [vmem:[#allocation8 + $0x300] ss:$16 sps:$4 sm:$0xff]  }
 0x10b   :  { %2474 = vmatpush1.bf16.msra.mxu0 %v3718_v45 }
 0x10c   :  { %2475 = vmatprep.subr.bf16.mxu0 %v3723_v46  ;;  %2515 = vmatpush1.bf16.msra.mxu1 %v3775_v3 }
 0x10d   :  { %2516 = vmatprep.subr.bf16.mxu1 %v3783_v53  ;;  %v347_v53 = vsub.s32 1, %v4134_v43 }
 0x10f   :  { %2476 = vmatpush1.bf16.msra.mxu0 %v3721_v20  ;;  %v3847_v20 = vld [vmem:[#allocation8 + $0x340] ss:$16 sps:$4 sm:$0xff]  }
 0x110   :  { %2477 = vmatprep.subr.bf16.mxu0 %v3726_v47  ;;  %2517 = vmatpush1.bf16.msra.mxu1 %v3781_v19  ;;  %v4182_v19 = vld [vmem:[#allocation7] sm:$0xf] }
 0x111   :  { %2518 = vmatprep.subr.bf16.mxu1 %v3789_v26 }
 0x113   :  { %2478 = vmatpush1.bf16.msra.mxu0 %v3724_v48  ;;  %v3855_v48 = vld [vmem:[#allocation8 + $0x324] ss:$16 sps:$4 sm:$0xff]  }
 0x114   :  { %2479 = vmatprep.subr.bf16.mxu0 %v3729_v50  ;;  %2519 = vmatpush1.bf16.msra.mxu1 %v3787_v56 }
 0x115   :  { %2520 = vmatprep.subr.bf16.mxu1 %v3795_v60 }
 0x117   :  { %2480 = vmatpush1.bf16.msra.mxu0 %v3727_v32  ;;  %v3858_v32 = vld [vmem:[#allocation8 + $0x304] ss:$16 sps:$4 sm:$0xff]  }
 0x118   :  { %2481 = vmatprep.subr.bf16.mxu0 %v3732_v31  ;;  %2521 = vmatpush1.bf16.msra.mxu1 %v3793_v59  ;;  %v3861_v31 = vld [vmem:[#allocation8 + $0x2ec] ss:$16 sps:$4 sm:$0xff]  }
 0x119   :  { %2522 = vmatprep.subr.bf16.mxu1 %v3801_v0 }
 0x11b   :  { %2482 = vmatpush1.bf16.msra.mxu0 %v3730_v52  ;;  %v343_v52 = vsub.s32 0, %v4134_v43 }
 0x11c   :  { %2483 = vmatprep.subr.bf16.mxu0 %v3735_v54  ;;  %2523 = vmatpush1.bf16.msra.mxu1 %v3799_v63 }
 0x11d   :  { %2524 = vmatprep.subr.bf16.mxu1 %v3807_v5  ;;  %v344_v54 = vrot.slane %v4182_v19, %v343_v52 }
 0x11f   :  { %2484 = vmatpush1.bf16.msra.mxu0 %v3733_v55  ;;  %v348_v55 = vrot.slane %v4182_v19, %v347_v53 }
 0x120   :  { %2485 = vmatprep.subr.bf16.mxu0 %v3738_v57  ;;  %2525 = vmatpush1.bf16.msra.mxu1 %v3805_v4 }
 0x121   :  { %2526 = vmatprep.subr.bf16.mxu1 %v3813_v9 }
 0x123   :  { %2486 = vmatpush1.bf16.msra.mxu0 %v3736_v58 }
 0x124   :  { %2487 = vmatprep.subr.bf16.mxu0 %v3741_v61  ;;  %2527 = vmatpush1.bf16.msra.mxu1 %v3811_v8  ;;  %v3763_v8 = vld [vmem:[#allocation8 + $0xe8] ss:$16 sps:$4 sm:$0xff]  }
 0x125   :  { %2528 = vmatprep.subr.bf16.mxu1 %v3819_v14  ;;  %v3766_v14 = vld [vmem:[#allocation8 + $0xc8] ss:$16 sps:$4 sm:$0xff]  }
 0x127   :  { %2488 = vmatpush2.bf16.msra.mxu0 %v3739_v62 }
 0x128   :  { %2489 = vmatprep.subr.bf16.mxu0 %v3744_v1  ;;  %2529 = vmatpush2.bf16.msra.mxu1 %v3817_v12 }
 0x129   :  { %2530 = vmatprep.subr.bf16.mxu1 %v3825_v18  ;;  %v3780_v18 = vld [vmem:[#allocation8 + $0x8c] ss:$16 sps:$4 sm:$0xff]  }
 0x12b   :  { %2490 = vmatpush2.bf16.msra.mxu0 %v3742_v2 }
 0x12c   :  { %2491 = vmatprep.subr.bf16.mxu0 %v3747_v6  ;;  %2531 = vmatpush2.bf16.msra.mxu1 %v3823_v17  ;;  %v3772_v17 = vld [vmem:[#allocation8 + $0xa8] ss:$16 sps:$4 sm:$0xff]  }
 0x12d   :  { %2532 = vmatprep.subr.bf16.mxu1 %v3831_v24  ;;  %v3792_v24 = vld [vmem:[#allocation8 + $0x4c] ss:$16 sps:$4 sm:$0xff]  }
 0x12f   :  { %2492 = vmatpush2.bf16.msra.mxu0 %v3745_v7 }
 0x130   :  { %2493 = vmatprep.subr.bf16.mxu0 %v3750_v10  ;;  %2533 = vmatpush2.bf16.msra.mxu1 %v3829_v23  ;;  %v3784_v23 = vld [vmem:[#allocation8 + $0x68] ss:$16 sps:$4 sm:$0xff]  }
 0x131   :  { %2534 = vmatprep.subr.bf16.mxu1 %v3837_v30  ;;  %v3804_v30 = vld [vmem:[#allocation8 + $0xc] ss:$16 sps:$4 sm:$0xff]  }
 0x133   :  { %2494 = vmatpush2.bf16.msra.mxu0 %v3748_v11  ;;  %v3768_v11 = vld [vmem:[#allocation8 + $0xcc] ss:$16 sps:$4 sm:$0xff]  }
 0x134   :  { %2495 = vmatprep.subr.bf16.mxu0 %v3753_v15  ;;  %2535 = vmatpush2.bf16.msra.mxu1 %v3835_v28  ;;  %v3796_v28 = vld [vmem:[#allocation8 + $0x28] ss:$16 sps:$4 sm:$0xff]  }
 0x135   :  { %2536 = vmatprep.subr.bf16.mxu1 %v3843_v37  ;;  %v3814_v37 = vld [vmem:[#allocation8 + $0x1c8] ss:$16 sps:$4 sm:$0xff]  }
 0x137   :  { %2496 = vmatpush2.bf16.msra.mxu0 %v3751_v16  ;;  %v3774_v16 = vld [vmem:[#allocation8 + $0xac] ss:$16 sps:$4 sm:$0xff]  }
 0x138   :  { %2497 = vmatprep.subr.bf16.mxu0 %v3756_v21  ;;  %2537 = vmatpush2.bf16.msra.mxu1 %v3841_v13  ;;  %v3778_v21 = vld [vmem:[#allocation8 + $0x88] ss:$16 sps:$4 sm:$0xff]  }
 0x139   :  { %2538 = vmatprep.subr.bf16.mxu1 %v3849_v44  ;;  %v3826_v13 = vld [vmem:[#allocation8 + $0x188] ss:$16 sps:$4 sm:$0xff]   ;;  %v3840_v44 = vld [vmem:[#allocation8 + $0x14c] ss:$16 sps:$4 sm:$0xff]  }
 0x13b   :  { %2498 = vmatpush2.bf16.msra.mxu0 %v3754_v22  ;;  %v3786_v22 = vld [vmem:[#allocation8 + $0x6c] ss:$16 sps:$4 sm:$0xff]  }
 0x13c   :  { %2499 = vmatprep.subr.bf16.mxu0 %v3759_v25  ;;  %2539 = vmatpush2.bf16.msra.mxu1 %v3847_v20  ;;  %v3790_v25 = vld [vmem:[#allocation8 + $0x48] ss:$16 sps:$4 sm:$0xff]   ;;  %v3846_v20 = vld [vmem:[#allocation8 + $0x12c] ss:$16 sps:$4 sm:$0xff]  }
 0x13d   :  { %2540 = vmatprep.subr.bf16.mxu1 %v3855_v48 }
 0x13e   :  { %v1379_v34 = vpop.f32.mrf.mxu0 }
 0x13f   :  { %v1420_v35 = vpop.f32.mrf.mxu1  ;;  %2500 = vmatpush2.bf16.msra.mxu0 %v3757_v27  ;;  %v1380_v56 = vadd.f32 %v1379_v34, %v344_v54  ;;  %v3798_v27 = vld [vmem:[#allocation8 + $0x2c] ss:$16 sps:$4 sm:$0xff]   ;;  %v3850_v54 = vld [vmem:[#allocation8 + $0x108] ss:$16 sps:$4 sm:$0xff]  }
 0x140   :  { %v1381_v38 = vpop.f32.mrf.mxu0  ;;  %2501 = vmatprep.subr.bf16.mxu0 %v3762_v33  ;;  %2541 = vmatpush2.bf16.msra.mxu1 %v3853_v49  ;;  %v3802_v33 = vld [vmem:[#allocation8 + $0x8] ss:$16 sps:$4 sm:$0xff]   ;;  %v3810_v34 = vld [vmem:[#allocation8 + $0x1ec] ss:$16 sps:$4 sm:$0xff]  }
 0x141   :  { %v1422_v39 = vpop.f32.mrf.mxu1  ;;  %2542 = vmatprep.subr.bf16.mxu1 %v3858_v32  ;;  %v1382_v26 = vadd.f32 %v1381_v38, %v348_v55  ;;  %v1421_v57 = vadd.f32 %v1420_v35, %v1380_v56  ;;  %v3808_v35 = vld [vmem:[#allocation8 + $0x1e8] ss:$16 sps:$4 sm:$0xff]   ;;  %v3822_v38 = vld [vmem:[#allocation8 + $0x1ac] ss:$16 sps:$4 sm:$0xff]  }
 0x142   :  { %v1383_v41 = vpop.f32.mrf.mxu0  ;;  %v3844_v49 = vld [vmem:[#allocation8 + $0x128] ss:$16 sps:$4 sm:$0xff]   ;;  %v3852_v32 = vld [vmem:[#allocation8 + $0x10c] ss:$16 sps:$4 sm:$0xff]  }
 0x143   :  { %v1424_v42 = vpop.f32.mrf.mxu1  ;;  %2502 = vmatpush2.bf16.msra.mxu0 %v3760_v36  ;;  %v1423_v59 = vadd.f32 %v1422_v39, %v1382_v26  ;;  %v3816_v36 = vld [vmem:[#allocation8 + $0x1cc] ss:$16 sps:$4 sm:$0xff]   ;;  %v3820_v39 = vld [vmem:[#allocation8 + $0x1a8] ss:$16 sps:$4 sm:$0xff]  }
 0x144   :  { %v1384_v45 = vpop.f32.mrf.mxu0  ;;  %2553 = vmatprep.subr.bf16.mxu0 %v3765_v40  ;;  %2543 = vmatpush2.bf16.msra.mxu1 %v3856_v51  ;;  %v3828_v40 = vld [vmem:[#allocation8 + $0x18c] ss:$16 sps:$4 sm:$0xff]   ;;  %v3832_v42 = vld [vmem:[#allocation8 + $0x168] ss:$16 sps:$4 sm:$0xff]  }
 0x145   :  { %v1425_v46 = vpop.f32.mrf.mxu1  ;;  %2594 = vmatprep.subr.bf16.mxu1 %v3861_v31  ;;  %v3834_v41 = vld [vmem:[#allocation8 + $0x16c] ss:$16 sps:$4 sm:$0xff]   ;;  %v351_v45 = vsub.s32 2, %v4134_v43 }
 0x146   :  { %v3838_v46 = vld [vmem:[#allocation8 + $0x148] ss:$16 sps:$4 sm:$0xff]  }
 0x147   :  { %v1502_v47 = vpop.f32.mrf.mxu1 }
 0x149   :  { %v1504_v29 = vpop.f32.mrf.mxu1 }
 0x14b   :  { %v1506_v50 = vpop.f32.mrf.mxu1 }
 0x14d   :  { %v1507_v3 = vpop.f32.mrf.mxu1 }
 0x17e   :  { %v1461_v58 = vpop.f32.mrf.mxu0 }
 0x17f   :  { %v1462_v60 = vadd.f32 %v1461_v58, %v1421_v57 }
 0x180   :  { %v1463_v61 = vpop.f32.mrf.mxu0 }
 0x181   :  { %v1503_v62 = vadd.f32 %v1502_v47, %v1462_v60  ;;  %v1464_v63 = vadd.f32 %v1463_v61, %v1423_v59  ;;  %v355_v47 = vsub.s32 3, %v4134_v43 }
 0x182   :  { %v1465_v0 = vpop.f32.mrf.mxu0 }
 0x183   :  { %v1505_v1 = vadd.f32 %v1504_v29, %v1464_v63  ;;  %v1673_v2 = vmax.f32 %v1503_v62, 0.0  ;;  %v352_v29 = vrot.slane %v4182_v19, %v351_v45  ;;  %v356_v3 = vrot.slane %v4182_v19, %v355_v47 }
 0x184   :  { %v1466_v4 = vpop.f32.mrf.mxu0 }
 0x185   :  { %v1674_v5 = vmax.f32 %v1505_v1, 0.0  ;;  %v4193_v9 = vpack.c.bf16 %v1673_v2, %v1673_v2 }
 0x187   :  { %v4191_v6 = vpop.f32.mrf.mxu1  ;;  %v1678_v7 = vpack.c.bf16 %v1674_v5, %v1674_v5 }
 0x188   :  { %v1544_v31 = vadd.f32 %v4191_v6, %v352_v29  ;;  %v3897_v29 = vld [vmem:[#allocation8 + $0x36c] ss:$16 sps:$4 sm:$0xff]  }
 0x189   :  { %v4195_v10 = vpop.f32.mrf.mxu1  ;;  %2503 = vmatprep.mubr.bf16.mxu0 %v1678_v7 }
 0x18a   :  { %2504 = vmatmul.mubr.bf16.vlgmr.msra.gmra.mxu0 %v4193_v9  ;;  %v1546_v56 = vadd.f32 %v4195_v10, %v356_v3  ;;  %v3859_v10 = vld [vmem:[#allocation8 + $0x2e8] ss:$16 sps:$4 sm:$0xff]   ;;  %v3903_v3 = vld [vmem:[#allocation8 + $0x32c] ss:$16 sps:$4 sm:$0xff]  }
 0x18b   :  { %v1547_v12 = vpop.f32.mrf.mxu1  ;;  %2554 = vmatpush1.bf16.msra.mxu0 %v3763_v8  ;;  %2585 = vmatprep.mubr.bf16.mxu0 %v1678_v7 }
 0x18c   :  { %2555 = vmatprep.subr.bf16.mxu0 %v3768_v11  ;;  %v3864_v12 = vld [vmem:[#allocation8 + $0x2cc] ss:$16 sps:$4 sm:$0xff]  }
 0x18d   :  { %v1548_v15 = vpop.f32.mrf.mxu1 }
 0x18e   :  { %v3908_v15 = vld [vmem:[#allocation10 + $0x38] sm:$0xff]  }
 0x18f   :  { %2556 = vmatpush1.bf16.msra.mxu0 %v3766_v14  ;;  %v3907_v14 = vld [vmem:[#allocation10 + $0x78] sm:$0xff]  }
 0x190   :  { %2557 = vmatprep.subr.bf16.mxu0 %v3774_v16  ;;  %v3909_v16 = vld [vmem:[#allocation10 + $0x70] sm:$0xff]  }
 0x193   :  { %2558 = vmatpush1.bf16.msra.mxu0 %v3772_v17  ;;  %v3867_v17 = vld [vmem:[#allocation8 + $0x2ac] ss:$16 sps:$4 sm:$0xff]  }
 0x194   :  { %2559 = vmatprep.subr.bf16.mxu0 %v3780_v18  ;;  %v3910_v18 = vld [vmem:[#allocation10 + $0x30] sm:$0xff]  }
 0x197   :  { %2560 = vmatpush1.bf16.msra.mxu0 %v3778_v21  ;;  %v3911_v21 = vld [vmem:[#allocation10 + $0x68] sm:$0xff]  }
 0x198   :  { %2561 = vmatprep.subr.bf16.mxu0 %v3786_v22  ;;  %v3865_v22 = vld [vmem:[#allocation8 + $0x2a8] ss:$16 sps:$4 sm:$0xff]  }
 0x19b   :  { %2562 = vmatpush1.bf16.msra.mxu0 %v3784_v23  ;;  %v3870_v23 = vld [vmem:[#allocation8 + $0x28c] ss:$16 sps:$4 sm:$0xff]  }
 0x19c   :  { %2563 = vmatprep.subr.bf16.mxu0 %v3792_v24  ;;  %v3912_v24 = vld [vmem:[#allocation10 + $0x28] sm:$0xff]  }
 0x19f   :  { %2564 = vmatpush1.bf16.msra.mxu0 %v3790_v25  ;;  %v3913_v25 = vld [vmem:[#allocation10 + $0x60] sm:$0xff]  }
 0x1a0   :  { %2565 = vmatprep.subr.bf16.mxu0 %v3798_v27  ;;  %v3868_v27 = vld [vmem:[#allocation8 + $0x288] ss:$16 sps:$4 sm:$0xff]  }
 0x1a3   :  { %2566 = vmatpush1.bf16.msra.mxu0 %v3796_v28  ;;  %v3873_v28 = vld [vmem:[#allocation8 + $0x26c] ss:$16 sps:$4 sm:$0xff]  }
 0x1a4   :  { %2567 = vmatprep.subr.bf16.mxu0 %v3804_v30  ;;  %v3914_v30 = vld [vmem:[#allocation10 + $0x20] sm:$0xff]  }
 0x1a7   :  { %2568 = vmatpush1.bf16.msra.mxu0 %v3802_v33  ;;  %v3871_v33 = vld [vmem:[#allocation8 + $0x268] ss:$16 sps:$4 sm:$0xff]  }
 0x1a8   :  { %2569 = vmatprep.subr.bf16.mxu0 %v3810_v34  ;;  %v3876_v34 = vld [vmem:[#allocation8 + $0x24c] ss:$16 sps:$4 sm:$0xff]  }
 0x1ab   :  { %2570 = vmatpush2.bf16.msra.mxu0 %v3808_v35  ;;  %v3874_v35 = vld [vmem:[#allocation8 + $0x248] ss:$16 sps:$4 sm:$0xff]  }
 0x1ac   :  { %2571 = vmatprep.subr.bf16.mxu0 %v3816_v36  ;;  %v3879_v36 = vld [vmem:[#allocation8 + $0x22c] ss:$16 sps:$4 sm:$0xff]  }
 0x1af   :  { %2572 = vmatpush2.bf16.msra.mxu0 %v3814_v37  ;;  %v3877_v37 = vld [vmem:[#allocation8 + $0x228] ss:$16 sps:$4 sm:$0xff]  }
 0x1b0   :  { %2573 = vmatprep.subr.bf16.mxu0 %v3822_v38  ;;  %v3882_v38 = vld [vmem:[#allocation8 + $0x20c] ss:$16 sps:$4 sm:$0xff]  }
 0x1b3   :  { %2574 = vmatpush2.bf16.msra.mxu0 %v3820_v39  ;;  %v3880_v39 = vld [vmem:[#allocation8 + $0x208] ss:$16 sps:$4 sm:$0xff]  }
 0x1b4   :  { %2575 = vmatprep.subr.bf16.mxu0 %v3828_v40  ;;  %v3885_v40 = vld [vmem:[#allocation8 + $0x3ec] ss:$16 sps:$4 sm:$0xff]  }
 0x1b7   :  { %2576 = vmatpush2.bf16.msra.mxu0 %v3826_v13  ;;  %v3883_v13 = vld [vmem:[#allocation8 + $0x3e8] ss:$16 sps:$4 sm:$0xff]  }
 0x1b8   :  { %2577 = vmatprep.subr.bf16.mxu0 %v3834_v41  ;;  %v3888_v41 = vld [vmem:[#allocation8 + $0x3cc] ss:$16 sps:$4 sm:$0xff]  }
 0x1bb   :  { %2578 = vmatpush2.bf16.msra.mxu0 %v3832_v42  ;;  %v3886_v42 = vld [vmem:[#allocation8 + $0x3c8] ss:$16 sps:$4 sm:$0xff]  }
 0x1bc   :  { %2579 = vmatprep.subr.bf16.mxu0 %v3840_v44  ;;  %v3891_v44 = vld [vmem:[#allocation8 + $0x3ac] ss:$16 sps:$4 sm:$0xff]  }
 0x1be   :  { %v1584_v48 = vpop.f32.mrf.mxu0 }
 0x1bf   :  { %2580 = vmatpush2.bf16.msra.mxu0 %v3838_v46  ;;  %v1585_v26 = vadd.f32 %v1584_v48, %v1544_v31  ;;  %v3889_v46 = vld [vmem:[#allocation8 + $0x3a8] ss:$16 sps:$4 sm:$0xff]   ;;  %v3906_v31 = vld [vmem:[#allocation8 + $0x30c] ss:$16 sps:$4 sm:$0xff]  }
 0x1c0   :  { %v1586_v50 = vpop.f32.mrf.mxu0  ;;  %2581 = vmatprep.subr.bf16.mxu0 %v3846_v20  ;;  %v3894_v20 = vld [vmem:[#allocation8 + $0x38c] ss:$16 sps:$4 sm:$0xff]   ;;  %v3892_v48 = vld [vmem:[#allocation8 + $0x388] ss:$16 sps:$4 sm:$0xff]  }
 0x1c1   :  { %v1587_v59 = vadd.f32 %v1586_v50, %v1546_v56  ;;  %v3900_v50 = vld [vmem:[#allocation8 + $0x34c] ss:$16 sps:$4 sm:$0xff]  }
 0x1c2   :  { %v1588_v51 = vpop.f32.mrf.mxu0  ;;  %v3916_v56 = vld [vmem:[#allocation10 + $0x18] sm:$0xff]  }
 0x1c3   :  { %2582 = vmatpush2.bf16.msra.mxu0 %v3844_v49  ;;  %v3895_v49 = vld [vmem:[#allocation8 + $0x368] ss:$16 sps:$4 sm:$0xff]  }
 0x1c4   :  { %v1589_v55 = vpop.f32.mrf.mxu0  ;;  %2583 = vmatprep.subr.bf16.mxu0 %v3852_v32  ;;  %v3898_v32 = vld [vmem:[#allocation8 + $0x348] ss:$16 sps:$4 sm:$0xff]  }
 0x1c5   :  { %v3901_v51 = vld [vmem:[#allocation8 + $0x328] ss:$16 sps:$4 sm:$0xff]  }
 0x1c6   :  { %v1666_v58 = vpop.f32.mrf.mxu0  ;;  %v3915_v55 = vld [vmem:[#allocation10 + $0x58] sm:$0xff]  }
 0x1c7   :  { %v1625_v57 = vpop.f32.mrf.mxu1  ;;  %2584 = vmatpush2.bf16.msra.mxu0 %v3850_v54  ;;  %v3904_v54 = vld [vmem:[#allocation8 + $0x308] ss:$16 sps:$4 sm:$0xff]  }
 0x1c8   :  { %v1626_v60 = vadd.f32 %v1625_v57, %v1585_v26  ;;  %v1668_v62 = vpop.f32.mrf.mxu0  ;;  %3363 = vmatprep.subr.bf16.mxu0 %v3907_v14  ;;  %v3917_v26 = vld [vmem:[#allocation10 + $0x50] sm:$0xff]  }
 0x1c9   :  { %v1627_v61 = vpop.f32.mrf.mxu1  ;;  %v3918_v57 = vld [vmem:[#allocation10 + $0x10] sm:$0xff]  }
 0x1ca   :  { %v1667_v63 = vadd.f32 %v1666_v58, %v1626_v60  ;;  %v1628_v0 = vadd.f32 %v1627_v61, %v1587_v59  ;;  %2586 = vmatmul.mubr.bf16.vlgmr.msra.gmra.mxu0 %v4193_v9  ;;  %v1670_v1 = vpop.f32.mrf.mxu0  ;;  %v3862_v9 = vld [vmem:[#allocation8 + $0x2c8] ss:$16 sps:$4 sm:$0xff]   ;;  %v3921_v60 = vld [vmem:[#allocation10 + $0x40] sm:$0xff]  }
 0x1cb   :  { %v1629_v19 = vpop.f32.mrf.mxu1  ;;  %3364 = vmatpush3.bf16.msra.mxu0 %v3908_v15  ;;  %v3919_v58 = vld [vmem:[#allocation10 + $0x48] sm:$0xff]   ;;  %v3922_v61 = vld [vmem:[#allocation10] sm:$0xff]  }
 0x1cc   :  { %v1669_v2 = vadd.f32 %v1668_v62, %v1628_v0  ;;  %v1675_v4 = vmax.f32 %v1667_v63, 0.0  ;;  %v1671_v6 = vpop.f32.mrf.mxu0  ;;  %3365 = vmatprep.subr.bf16.mxu0 %v3909_v16  ;;  %v3920_v59 = vld [vmem:[#allocation10 + $0x8] sm:$0xff]   ;;  %v3923_v62 = vld [vmem:[#allocation10 + $0xf8] sm:$0xff]   ;;  %v3925_v0 = vld [vmem:[#allocation10 + $0xf0] sm:$0xff]  }
 0x1cd   :  { %v1630_v5 = vpop.f32.mrf.mxu1  ;;  %v3924_v63 = vld [vmem:[#allocation10 + $0xb8] sm:$0xff]   ;;  %v3926_v19 = vld [vmem:[#allocation10 + $0xb0] sm:$0xff]   ;;  %v3927_v1 = vld [vmem:[#allocation10 + $0xe8] sm:$0xff]  }
 0x1ce   :  { %v1676_v7 = vmax.f32 %v1669_v2, 0.0  ;;  %v4209_v11 = vpack.c.bf16 %v1675_v4, %v1675_v4  ;;  %v3928_v2 = vld [vmem:[#allocation10 + $0xa8] sm:$0xff]   ;;  %v3929_v4 = vld [vmem:[#allocation10 + $0xe0] sm:$0xff]   ;;  %v3931_v6 = vld [vmem:[#allocation10 + $0xd8] sm:$0xff]  }
 0x1cf   :  { %3366 = vmatpush3.bf16.msra.mxu0 %v3910_v18  ;;  %v3930_v5 = vld [vmem:[#allocation10 + $0xa0] sm:$0xff]   ;;  %v3935_v16 = vld [vmem:[#allocation10 + $0xc8] sm:$0xff]  }
 0x1d0   :  { %v1680_v8 = vpack.c.bf16 %v1676_v7, %v1676_v7  ;;  %3367 = vmatprep.subr.bf16.mxu0 %v3911_v21  ;;  %v3932_v7 = vld [vmem:[#allocation10 + $0x98] sm:$0xff]   ;;  %v3938_v18 = vld [vmem:[#allocation10 + $0x80] sm:$0xff]   ;;  %v1809_v21 = vld [vmem:[%s4234_s4] sm:$0xf] }
 0x1d2   :  { %2544 = vmatprep.mubr.bf16.mxu1 %v1680_v8 }
 0x1d3   :  { %2545 = vmatmul.mubr.bf16.vlgmr.msra.gmra.mxu1 %v4209_v11  ;;  %3368 = vmatpush3.bf16.msra.mxu0 %v3912_v24  ;;  %v1814_v24 = vrot.slane %v1809_v21, %v343_v52  ;;  %v1822_v52 = vrot.slane %v1809_v21, %v351_v45 }
 0x1d4   :  { %2595 = vmatpush1.bf16.msra.mxu1 %v3859_v10  ;;  %2626 = vmatprep.mubr.bf16.mxu1 %v1680_v8  ;;  %v3933_v8 = vld [vmem:[#allocation10 + $0xd0] sm:$0xff]  }
 0x1d5   :  { %2596 = vmatprep.subr.bf16.mxu1 %v3864_v12  ;;  %3369 = vmatprep.subr.bf16.mxu0 %v3913_v25  ;;  %v3934_v10 = vld [vmem:[#allocation10 + $0x90] sm:$0xff]  }
 0x1d7   :  { %3370 = vmatpush3.bf16.msra.mxu0 %v3914_v30 }
 0x1d8   :  { %2597 = vmatpush1.bf16.msra.mxu1 %v3862_v9  ;;  %3371 = vmatprep.subr.bf16.mxu0 %v3915_v55  ;;  %v3936_v9 = vld [vmem:[#allocation10 + $0x88] sm:$0xff]  }
 0x1d9   :  { %2598 = vmatprep.subr.bf16.mxu1 %v3867_v17  ;;  %v3937_v17 = vld [vmem:[#allocation10 + $0xc0] sm:$0xff]  }
 0x1db   :  { %3372 = vmatpush3.bf16.msra.mxu0 %v3916_v56 }
 0x1dc   :  { %2599 = vmatpush1.bf16.msra.mxu1 %v3865_v22  ;;  %3373 = vmatprep.subr.bf16.mxu0 %v3917_v26 }
 0x1dd   :  { %2600 = vmatprep.subr.bf16.mxu1 %v3870_v23 }
 0x1df   :  { %3374 = vmatpush3.bf16.msra.mxu0 %v3918_v57 }
 0x1e0   :  { %2601 = vmatpush1.bf16.msra.mxu1 %v3868_v27  ;;  %3375 = vmatprep.subr.bf16.mxu0 %v3919_v58  ;;  %v1818_v27 = vrot.slane %v1809_v21, %v347_v53  ;;  %v1826_v53 = vrot.slane %v1809_v21, %v355_v47  ;;  %v3330_v47 = vld [vmem:[%s4236_s6] ss:$0 sm:$0xff] }
 0x1e1   :  { %2602 = vmatprep.subr.bf16.mxu1 %v3873_v28 }
 0x1e3   :  { %3376 = vmatpush3.bf16.msra.mxu0 %v3920_v59 }
 0x1e4   :  { %2603 = vmatpush1.bf16.msra.mxu1 %v3871_v33  ;;  %3377 = vmatprep.subr.bf16.mxu0 %v3921_v60 }
 0x1e5   :  { %2604 = vmatprep.subr.bf16.mxu1 %v3876_v34 }
 0x1e7   :  { %3378 = vmatpush3.bf16.msra.mxu0 %v3922_v61 }
 0x1e8   :  { %2605 = vmatpush1.bf16.msra.mxu1 %v3874_v35 }
 0x1e9   :  { %2606 = vmatprep.subr.bf16.mxu1 %v3879_v36 }
 0x1ec   :  { %2607 = vmatpush1.bf16.msra.mxu1 %v3877_v37 }
 0x1ed   :  { %2608 = vmatprep.subr.bf16.mxu1 %v3882_v38 }
 0x1f0   :  { %2609 = vmatpush1.bf16.msra.mxu1 %v3880_v39 }
 0x1f1   :  { %2610 = vmatprep.subr.bf16.mxu1 %v3885_v40 }
 0x1f4   :  { %2611 = vmatpush2.bf16.msra.mxu1 %v3883_v13 }
 0x1f5   :  { %2612 = vmatprep.subr.bf16.mxu1 %v3888_v41 }
 0x1f8   :  { %2613 = vmatpush2.bf16.msra.mxu1 %v3886_v42 }
 0x1f9   :  { %2614 = vmatprep.subr.bf16.mxu1 %v3891_v44 }
 0x1fc   :  { %2615 = vmatpush2.bf16.msra.mxu1 %v3889_v46 }
 0x1fd   :  { %2616 = vmatprep.subr.bf16.mxu1 %v3894_v20 }
 0x200   :  { %2617 = vmatpush2.bf16.msra.mxu1 %v3892_v48 }
 0x201   :  { %2618 = vmatprep.subr.bf16.mxu1 %v3897_v29 }
 0x204   :  { %2619 = vmatpush2.bf16.msra.mxu1 %v3895_v49 }
 0x205   :  { %2620 = vmatprep.subr.bf16.mxu1 %v3900_v50 }
 0x208   :  { %2621 = vmatpush2.bf16.msra.mxu1 %v3898_v32 }
 0x209   :  { %2622 = vmatprep.subr.bf16.mxu1 %v3903_v3 }
 0x20c   :  { %2623 = vmatpush2.bf16.msra.mxu1 %v3901_v51 }
 0x20d   :  { %2624 = vmatprep.subr.bf16.mxu1 %v3906_v31 }
 0x210   :  { %2625 = vmatpush2.bf16.msra.mxu1 %v3904_v54 }
 0x211   :  { %3385 = vmatprep.subr.bf16.mxu1 %v3923_v62 }
 0x213   :  { %2627 = vmatmul.mubr.bf16.vlgmr.msra.gmra.mxu1 %v4209_v11 }
 0x214   :  { %3386 = vmatpush3.bf16.msra.mxu1 %v3924_v63 }
 0x215   :  { %3387 = vmatprep.subr.bf16.mxu1 %v3925_v0 }
 0x218   :  { %3388 = vmatpush3.bf16.msra.mxu1 %v3926_v19 }
 0x219   :  { %3389 = vmatprep.subr.bf16.mxu1 %v3927_v1 }
 0x21c   :  { %3390 = vmatpush3.bf16.msra.mxu1 %v3928_v2 }
 0x21d   :  { %3391 = vmatprep.subr.bf16.mxu1 %v3929_v4 }
 0x220   :  { %3392 = vmatpush3.bf16.msra.mxu1 %v3930_v5 }
 0x221   :  { %3393 = vmatprep.subr.bf16.mxu1 %v3931_v6 }
 0x224   :  { %3394 = vmatpush3.bf16.msra.mxu1 %v3932_v7 }
 0x225   :  { %3395 = vmatprep.subr.bf16.mxu1 %v3933_v8 }
 0x228   :  { %3396 = vmatpush3.bf16.msra.mxu1 %v3934_v10 }
 0x229   :  { %3397 = vmatprep.subr.bf16.mxu1 %v3935_v16 }
 0x22c   :  { %3398 = vmatpush3.bf16.msra.mxu1 %v3936_v9 }
 0x22d   :  { %3399 = vmatprep.subr.bf16.mxu1 %v3937_v17 }
 0x230   :  { %3400 = vmatpush3.bf16.msra.mxu1 %v3938_v18 }
 0x24a   :  { %v2505_v11 = vpop.f32.mrf.mxu0 }
 0x24b   :  { %v2506_v30 = vadd.f32 %v2505_v11, %v1814_v24 }
 0x24c   :  { %v2507_v12 = vpop.f32.mrf.mxu0 }
 0x24d   :  { %v2508_v34 = vadd.f32 %v2507_v12, %v1818_v27 }
 0x24e   :  { %v2509_v14 = vpop.f32.mrf.mxu0 }
 0x250   :  { %v2510_v15 = vpop.f32.mrf.mxu0 }
 0x28a   :  { %v2587_v22 = vpop.f32.mrf.mxu0 }
 0x28b   :  { %v2588_v44 = vadd.f32 %v2587_v22, %v1822_v52 }
 0x28c   :  { %v2589_v23 = vpop.f32.mrf.mxu0 }
 0x28d   :  { %v2590_v20 = vadd.f32 %v2589_v23, %v1826_v53 }
 0x28e   :  { %v2591_v25 = vpop.f32.mrf.mxu0 }
 0x290   :  { %v2592_v28 = vpop.f32.mrf.mxu0 }
 0x293   :  { %v2546_v33 = vpop.f32.mrf.mxu1 }
 0x294   :  { %v2547_v35 = vadd.f32 %v2546_v33, %v2506_v30 }
 0x295   :  { %v2548_v36 = vpop.f32.mrf.mxu1 }
 0x296   :  { %v2549_v37 = vadd.f32 %v2548_v36, %v2508_v34  ;;  %v2635_v38 = vmax.f32 %v2547_v35, 0.0 }
 0x297   :  { %v2550_v39 = vpop.f32.mrf.mxu1 }
 0x298   :  { %v2636_v40 = vmax.f32 %v2549_v37, 0.0  ;;  %v2639_v42 = vpack.c.bf16 %v2635_v38, %v2635_v38 }
 0x299   :  { %v2551_v13 = vpop.f32.mrf.mxu1 }
 0x29a   :  { %v2640_v41 = vpack.c.bf16 %v2636_v40, %v2636_v40 }
 0x29c   :  { %2938 = vmatprep.mubr.bf16.mxu0 %v2640_v41 }
 0x29d   :  { %2939 = vmatmul.mubr.bf16.vlgmr.msra.gmra.mxu0 %v2639_v42 }
 0x2d3   :  { %v2628_v46 = vpop.f32.mrf.mxu1 }
 0x2d4   :  { %v2629_v48 = vadd.f32 %v2628_v46, %v2588_v44 }
 0x2d5   :  { %v2630_v29 = vpop.f32.mrf.mxu1 }
 0x2d6   :  { %v2631_v49 = vadd.f32 %v2630_v29, %v2590_v20  ;;  %v2637_v50 = vmax.f32 %v2629_v48, 0.0 }
 0x2d7   :  { %v2632_v32 = vpop.f32.mrf.mxu1 }
 0x2d8   :  { %v2638_v3 = vmax.f32 %v2631_v49, 0.0  ;;  %v2641_v54 = vpack.c.bf16 %v2637_v50, %v2637_v50 }
 0x2d9   :  { %v2633_v51 = vpop.f32.mrf.mxu1 }
 0x2da   :  { %v2642_v31 = vpack.c.bf16 %v2638_v3, %v2638_v3 }
 0x2dc   :  { %2978 = vmatprep.mubr.bf16.mxu1 %v2642_v31 }
 0x2dd   :  { %2979 = vmatmul.mubr.bf16.vlgmr.msra.gmra.mxu1 %v2641_v54 }
 0x35d   :  { %v3379_v55 = vpop.f32.mrf.mxu0 }
 0x35f   :  { %v3380_v56 = vpop.f32.mrf.mxu0 }
 0x360   :  { %v3381_v43 = vadd.f32 %v3380_v56, %v3379_v55 }
 0x361   :  { %v3382_v45 = vpop.f32.mrf.mxu0 }
 0x362   :  { %v2941_v59 = vadd.f32 %v3381_v43, %v3330_v47 }
 0x363   :  { %v3383_v26 = vpop.f32.mrf.mxu0 }
 0x39d   :  { %v3401_v57 = vpop.f32.mrf.mxu1 }
 0x39f   :  { %v3402_v58 = vpop.f32.mrf.mxu1 }
 0x3a0   :  { %v3403_v60 = vadd.f32 %v3402_v58, %v3401_v57 }
 0x3a1   :  { %v3404_v61 = vpop.f32.mrf.mxu1 }
 0x3a2   :  { %v2981_v62 = vadd.f32 %v3403_v60, %v2941_v59 }
 0x3a3   :  { %v3405_v63 = vpop.f32.mrf.mxu1 }
 0x3a4   :  { %2986 = vst [vmem:[#allocation11] sm:$0x3] %v2981_v62 }
 0x3a5   :  { %4050 = shalt.err (!%p4047_p1)
}
 0x3a6   :  { %2996 = dma.vmem_to_hbm [thread:$0]  %s2994_s29, 32, %s4237_s7, [#allocation4]  }
 0x3a7   :  { %4065 = dma.done.wait [#allocation4], 32  }
 0x3a8   :  { %4066 = vsyncadd [#allocation4], 4294967264 }
 0x3a9   :  { %3000 = vsyncpa [#allocation3], 1 }
 0x3aa   :  { %3001 = vsyncpa [#allocation6], 1 }
 0x3ab   :  { %3002 = vsyncpa [#allocation9], 1 }
 0x3ac   :  { %3003 = vsyncpa [#allocation4], 1 }

</bundles_post_ra>
